<compile_context>
chip_gen: v5e
topology: v5e:2x2
jax: 0.10.0
libtpu: 0.0.40
codegen_flags: <defaults>
</compile_context>

<pallas_src>
import functools
import numpy as np

import jax
import jax.numpy as jnp
from jax.experimental import pallas as pl
from jax.experimental.pallas import tpu as pltpu


_NEG = -1.0e9        # finite "minus infinity" for the block-diagonal attention bias
_LANES = 128


# ----------------------------- JAX glue helpers -----------------------------

def _round_up(a, m):
    return ((a + m - 1) // m) * m


def window_partition(x, ws):
    # x: (B, H, W, C) -> (B * H/ws * W/ws, ws, ws, C)
    B, H, W, C = x.shape
    x = x.reshape(B, H // ws, ws, W // ws, ws, C)
    return x.transpose(0, 1, 3, 2, 4, 5).reshape(-1, ws, ws, C)


def window_reverse(windows, ws, H, W):
    # windows: (B * H/ws * W/ws, ws, ws, C) -> (B, H, W, C)
    B = windows.shape[0] // (H * W // ws // ws)
    x = windows.reshape(B, H // ws, W // ws, ws, ws, -1)
    return x.transpose(0, 1, 3, 2, 4, 5).reshape(B, H, W, -1)


def create_attn_mask(H, W, ws, ss):
    # Reproduces SwinTransformerBlock.create_mask (H, W divisible by ws).
    img_mask = np.zeros((1, H, W, 1), np.float32)
    cnt = 0
    for h in (slice(0, -ws), slice(-ws, -ss), slice(-ss, None)):
        for w in (slice(0, -ws), slice(-ws, -ss), slice(-ss, None)):
            img_mask[:, h, w, :] = cnt
            cnt += 1
    mw = img_mask.reshape(1, H // ws, ws, W // ws, ws, 1).transpose(0, 1, 3, 2, 4, 5)
    mw = mw.reshape(-1, ws * ws)
    attn_mask = mw[:, None, :] - mw[:, :, None]               # (nW, N, N)
    attn_mask = np.where(attn_mask != 0, -100.0, 0.0).astype(np.float32)
    return jnp.asarray(attn_mask)


def relative_position_index(ws):
    coords = np.stack(np.meshgrid(np.arange(ws), np.arange(ws), indexing="ij"))
    cf = coords.reshape(2, -1)
    rel = (cf[:, :, None] - cf[:, None, :]).transpose(1, 2, 0)
    rel[:, :, 0] += ws - 1
    rel[:, :, 1] += ws - 1
    rel[:, :, 0] *= 2 * ws - 1
    return rel.sum(-1)                                        # (N, N)


def _pad2(a, rows, cols):
    return jnp.pad(a, ((0, rows - a.shape[0]), (0, cols - a.shape[1])))


def _row(v, n):
    return jnp.pad(v, (0, n - v.shape[0])).reshape(1, n)


# ----------------------- explicit pl.Buffered(1) feature probe -----------------------

@functools.lru_cache(maxsize=1)
def _buffered_single_supported():
    """Explicitly detect support for single-buffered grid-invariant operands.

    This is a dedicated feature probe (a tiny copy kernel).  Its failure only means
    "feature unavailable"; the real kernels are never wrapped in a broad except.
    """
    if not hasattr(pl, "Buffered"):
        return False

    def k(x_ref, w_ref, o_ref):
        o_ref[...] = x_ref[...] + w_ref[...]

    try:
        out = pl.pallas_call(
            k,
            out_shape=jax.ShapeDtypeStruct((16, 128), jnp.float32),
            grid=(2,),
            in_specs=[pl.BlockSpec((8, 128), lambda i: (i, 0)),
                      pl.BlockSpec((8, 128), lambda i: (0, 0),
                                   pipeline_mode=pl.Buffered(1))],
            out_specs=pl.BlockSpec((8, 128), lambda i: (i, 0)),
        )(jnp.ones((16, 128), jnp.float32), jnp.ones((8, 128), jnp.float32))
        jax.block_until_ready(out)
        return True
    except Exception:
        return False


# -------------------------- Pallas linear (conv-as-matmul) --------------------------

def _linear_bias_kernel(x_ref, w_ref, b_ref, o_ref, *, mm_dtype):
    acc = jnp.dot(x_ref[...].astype(mm_dtype), w_ref[...],
                  preferred_element_type=jnp.float32)
    o_ref[...] = (acc + b_ref[...]).astype(o_ref.dtype)


def _choose_tm(M):
    # Prefer >=4 grid steps (v7x two-TC pipelining), then >=2, else one block.
    for min_steps in (4, 2, 1):
        for cand in (128, 256, 64, 512, 32, 16, 8):
            if M % cand == 0 and M // cand >= min_steps:
                return cand
    return M


def pallas_linear(x2d, w, b, *, mm_dtype=jnp.float32):
    """x2d: (M, K) f32, w: (K, Nc) already in mm_dtype, b: (Nc,) f32."""
    M, K = x2d.shape
    Kw, Nc = w.shape
    assert K == Kw and b.shape == (Nc,)
    tm = _choose_tm(M)

    use_buf1 = _buffered_single_supported()
    const_kw = {"pipeline_mode": pl.Buffered(1)} if use_buf1 else {}
    w_spec = pl.BlockSpec((K, Nc), lambda i: (0, 0), **const_kw)
    b_spec = pl.BlockSpec((1, Nc), lambda i: (0, 0), **const_kw)

    n_const_buf = 1 if use_buf1 else 2
    wbytes = int(np.prod(w.shape)) * w.dtype.itemsize
    vmem_limit = int(2 * (tm * K + tm * Nc) * 4 + n_const_buf * (wbytes + Nc * 4)
                     + 6 * 1024 * 1024)

    return pl.pallas_call(
        functools.partial(_linear_bias_kernel, mm_dtype=mm_dtype),
        out_shape=jax.ShapeDtypeStruct((M, Nc), x2d.dtype),
        grid_spec=pltpu.PrefetchScalarGridSpec(
            num_scalar_prefetch=0,
            grid=(M // tm,),
            in_specs=[pl.BlockSpec((tm, K), lambda i: (i, 0)), w_spec, b_spec],
            out_specs=pl.BlockSpec((tm, Nc), lambda i: (i, 0)),
        ),
        compiler_params=pltpu.CompilerParams(
            dimension_semantics=("parallel",),
            vmem_limit_bytes=vmem_limit,
        ),
    )(x2d, w, b.reshape(1, Nc))


# ------------------ fused attention bias (relb + shift mask + block-diag) ------------------

def _blockdiag(win_bias):
    """(WB, nh, N, N) per-window bias -> (nh, WB*N, WB*N) with -1e9 off-diagonal."""
    WB, nh, N, _ = win_bias.shape
    eye = jnp.eye(WB, dtype=bool)[:, :, None, None, None]          # (WB, WB, 1, 1, 1)
    full = jnp.where(eye, win_bias[:, None], jnp.float32(_NEG))    # (WB, WB, nh, N, N)
    return full.transpose(2, 0, 3, 1, 4).reshape(nh, WB * N, WB * N)


def build_attn_bias(relb, mask, B_, nW, WB, N, nh):
    """Returns (bias, bias_steps): bias is (bias_steps*nh, M, M) f32 where the
    kernel adds bias[step*nh + h] once per head (no per-window mask operand)."""
    steps = B_ // WB
    if mask is None:
        win_bias = jnp.broadcast_to(relb[None], (WB, nh, N, N))
        return _blockdiag(win_bias), 1
    widx = (jnp.arange(steps)[:, None] * WB + jnp.arange(WB)[None, :]) % nW
    wb_bias = relb[None, None] + mask[widx][:, :, None]            # (steps, WB, nh, N, N)
    groups = jax.vmap(_blockdiag)(wb_bias)                         # (steps, nh, M, M)
    M = WB * N
    return groups.reshape(steps * nh, M, M), steps


def _choose_window_batch(B_, nW, N, max_rows=256, min_steps=4):
    """Windows per grid step: aim for 128 lane-dense attention rows, keep >=4 grid
    steps when possible (v7x: 2 TCs, each pipelining >=2 steps), cap at 256 rows
    (v5e 128x128 MXU, spill pressure)."""
    cands = [wb for wb in range(1, nW + 1)
             if nW % wb == 0 and B_ % wb == 0 and wb * N <= max_rows]
    if not cands:
        return 1

    def score(wb):
        rows, steps = wb * N, B_ // wb
        return (rows >= 128, steps >= min_steps, rows)

    return max(cands, key=score)


# ------------------------------- Swin block kernel -------------------------------

def swin_block_kernel(x_ref, g_ref, bias_ref,
                      n1g_ref, n1b_ref, n2g_ref, n2b_ref,
                      wq_ref, bq_ref, wk_ref, bk_ref, wv_ref, bv_ref,
                      wp_ref, bp_ref, w1_ref, b1_ref, w2_ref, b2_ref,
                      out_ref, *, num_heads, head_dim, n_valid,
                      mm_dtype, approx_recip):
    M, Cp = x_ref.shape
    hd = head_dim
    inv_n = 1.0 / float(n_valid)
    pad_frac = float(Cp - n_valid) / float(n_valid)

    x = x_ref[...]          # (M, Cp) f32, padded lanes are zero
    g = g_ref[...]

    def layer_norm(v, gamma, beta):
        # LayerNorm over the n_valid real channels (padded lanes of v are zero and
        # gamma/beta are zero-padded, so the pad-lane output stays exactly zero).
        mu = jnp.sum(v, axis=-1, keepdims=True) * inv_n
        d = v - mu
        var = jnp.sum(d * d, axis=-1, keepdims=True) * inv_n - pad_frac * (mu * mu)
        return d * jax.lax.rsqrt(var + 1e-5) * gamma + beta

    def mm(a, w_ref_):      # MXU matmul: bf16|f32 operands, f32 accumulation
        return jnp.dot(a.astype(mm_dtype), w_ref_[...],
                       preferred_element_type=jnp.float32)

    xn = layer_norm(x, n1g_ref[...], n1b_ref[...])
    gn = layer_norm(g, n1g_ref[...], n1b_ref[...])

    # qk scale is folded into wq/bq in the wrapper (free).
    q = mm(xn, wq_ref) + bq_ref[...]
    k = mm(gn, wk_ref) + bk_ref[...]
    v = mm(gn, wv_ref) + bv_ref[...]

    # Block-diagonal windowed attention: per (real) head, ONE lane-dense (M, M)
    # score matmul; the fused bias carries rel-pos-bias + shift mask on diagonal
    # window blocks and -1e9 off-diagonal (added in f32 after f32 accumulation).
    head_outs = []
    for h in range(num_heads):
        sl = slice(h * hd, (h + 1) * hd)
        qh = q[:, sl].astype(mm_dtype)
        kh = k[:, sl].astype(mm_dtype)
        vh = v[:, sl].astype(mm_dtype)
        s = jnp.einsum("nd,md->nm", qh, kh,
                       preferred_element_type=jnp.float32)          # (M, M)
        s = s + bias_ref[h]
        s = s - jnp.max(s, axis=-1, keepdims=True)
        p = jnp.exp(s)
        p = p * pl.reciprocal(jnp.sum(p, axis=-1, keepdims=True), approx=approx_recip)
        head_outs.append(jnp.dot(p.astype(mm_dtype), vh,
                                 preferred_element_type=jnp.float32))  # (M, hd)
    if Cp > num_heads * hd:
        # dummy padded head: its projection rows in wp are zero, so zeros are exact.
        head_outs.append(jnp.zeros((M, Cp - num_heads * hd), jnp.float32))
    o = jnp.concatenate(head_outs, axis=-1)                          # (M, Cp)

    o = mm(o, wp_ref) + bp_ref[...]
    y = x + o                                                        # residual (f32)

    yn = layer_norm(y, n2g_ref[...], n2b_ref[...])
    hmid = mm(yn, w1_ref) + b1_ref[...]
    # exact GELU; cast to mm_dtype in one expression so the MLP hidden lives narrow.
    hmid = (0.5 * hmid * (1.0 + jax.lax.erf(hmid * (1.0 / np.sqrt(2.0))))).astype(mm_dtype)
    out = y + jnp.dot(hmid, w2_ref[...], preferred_element_type=jnp.float32) + b2_ref[...]

    out_ref[...] = out.astype(out_ref.dtype)


def prepare_block_params(blk, C, Cp, num_heads, window_size, mm_dtype):
    """Zero-pad weights/LN params to the lane-dense Cp channel dim, fold the qk
    scale into wq/bq, pre-cast weight matrices to mm_dtype (bf16 in fast_math)."""
    hd = C // num_heads
    scale = float(hd) ** -0.5
    hidden = blk["w1"].shape[1]
    wk, wv = blk["wkv"][:, :C], blk["wkv"][:, C:]
    bk, bv = blk["bkv"][:C], blk["bkv"][C:]

    p = {
        "n1g": _row(blk["n1g"], Cp), "n1b": _row(blk["n1b"], Cp),
        "n2g": _row(blk["n2g"], Cp), "n2b": _row(blk["n2b"], Cp),
        "wq": _pad2(blk["wq"] * scale, Cp, Cp).astype(mm_dtype),
        "bq": _row(blk["bq"] * scale, Cp),
        "wk": _pad2(wk, Cp, Cp).astype(mm_dtype), "bk": _row(bk, Cp),
        "wv": _pad2(wv, Cp, Cp).astype(mm_dtype), "bv": _row(bv, Cp),
        "wp": _pad2(blk["wp"], Cp, Cp).astype(mm_dtype), "bp": _row(blk["bp"], Cp),
        "w1": _pad2(blk["w1"], Cp, hidden).astype(mm_dtype), "b1": blk["b1"].reshape(1, hidden),
        "w2": _pad2(blk["w2"], hidden, Cp).astype(mm_dtype), "b2": _row(blk["b2"], Cp),
    }
    N = window_size * window_size
    rpi = relative_position_index(window_size).reshape(-1)
    p["relb"] = blk["rpb_table"][rpi].reshape(N, N, num_heads).transpose(2, 0, 1)
    return p


def swin_block_forward(x, guided, H, W, pp, *, window_size, shift_size,
                       num_heads, c_true, fast_math=True):
    """x, guided: (B, L, Cp) lane-padded activations (padded lanes zero)."""
    B, L, Cp = x.shape
    assert L == H * W
    ws = window_size
    N = ws * ws
    nW = (H // ws) * (W // ws)
    B_ = B * nW
    mm_dtype = jnp.bfloat16 if fast_math else jnp.float32

    xi = x.reshape(B, H, W, Cp)
    gi = guided.reshape(B, H, W, Cp)
    if shift_size > 0:
        xi = jnp.roll(xi, (-shift_size, -shift_size), (1, 2))
        gi = jnp.roll(gi, (-shift_size, -shift_size), (1, 2))
        mask = create_attn_mask(H, W, ws, shift_size)        # (nW, N, N)
    else:
        mask = None

    xw = window_partition(xi, ws).reshape(B_ * N, Cp)
    gw = window_partition(gi, ws).reshape(B_ * N, Cp)

    WB = _choose_window_batch(B_, nW, N)
    M = WB * N
    steps = B_ // WB

    bias, bias_steps = build_attn_bias(pp["relb"], mask, B_, nW, WB, N, num_heads)

    use_buf1 = _buffered_single_supported()
    const_kw = {"pipeline_mode": pl.Buffered(1)} if use_buf1 else {}

    def const_spec(a):
        return pl.BlockSpec(a.shape, lambda i: (0,) * a.ndim, **const_kw)

    tok_spec = pl.BlockSpec((M, Cp), lambda i: (i, 0))
    if bias_steps > 1:
        bias_spec = pl.BlockSpec((num_heads, M, M), lambda i: (i, 0, 0))
    else:
        bias_spec = pl.BlockSpec((num_heads, M, M), lambda i: (0, 0, 0), **const_kw)

    consts = [pp["n1g"], pp["n1b"], pp["n2g"], pp["n2b"],
              pp["wq"], pp["bq"], pp["wk"], pp["bk"], pp["wv"], pp["bv"],
              pp["wp"], pp["bp"], pp["w1"], pp["b1"], pp["w2"], pp["b2"]]

    # Right-sized VMEM budget: double-buffered blocks + constants + fixed headroom
    # for compiler temporaries / spill (kept far below v7x's 64 MiB per TC).
    blk_bytes = 3 * M * Cp * 4
    bias_bytes = num_heads * M * M * 4
    const_bytes = sum(int(np.prod(a.shape)) * a.dtype.itemsize for a in consts)
    n_const_buf = 1 if use_buf1 else 2
    vmem_limit = int(2 * (blk_bytes + bias_bytes) + n_const_buf * const_bytes
                     + 12 * 1024 * 1024)

    kern = functools.partial(
        swin_block_kernel, num_heads=num_heads, head_dim=c_true // num_heads,
        n_valid=c_true, mm_dtype=mm_dtype, approx_recip=fast_math)

    out = pl.pallas_call(
        kern,
        out_shape=jax.ShapeDtypeStruct((B_ * N, Cp), x.dtype),
        grid_spec=pltpu.PrefetchScalarGridSpec(
            num_scalar_prefetch=0,
            grid=(steps,),
            in_specs=[tok_spec, tok_spec, bias_spec] + [const_spec(a) for a in consts],
            out_specs=pl.BlockSpec((M, Cp), lambda i: (i, 0)),
        ),
        compiler_params=pltpu.CompilerParams(
            dimension_semantics=("parallel",),
            vmem_limit_bytes=vmem_limit,
        ),
    )(xw, gw, bias, *consts)

    out = window_reverse(out.reshape(B_, ws, ws, Cp), ws, H, W)
    if shift_size > 0:
        out = jnp.roll(out, (shift_size, shift_size), (1, 2))
    return out.reshape(B, L, Cp)


# ------------------------------- full Spatial_aligner -------------------------------

def spatial_aligner_forward(x, guided, params, *, patch_size, window_size,
                            num_heads, fast_math=True):
    B, Cin, H, W = x.shape
    ps = patch_size
    H2, W2 = H // ps, W // ps
    L = H2 * W2
    embed = params["pe1_w"].shape[0]
    Cp = _round_up(embed, _LANES)                # lane-dense channel padding 96 -> 128
    mm_dtype = jnp.bfloat16 if fast_math else jnp.float32

    def patch_embed(img, w, b):
        # Conv2d(k=ps, s=ps) == space-to-depth + matmul; output zero-padded to Cp lanes.
        pat = img.reshape(B, Cin, H2, ps, W2, ps).transpose(0, 2, 4, 1, 3, 5)
        pat = pat.reshape(B * L, Cin * ps * ps)
        wmat = w.reshape(embed, Cin * ps * ps).T                       # (K, embed)
        wmat = jnp.pad(wmat, ((0, 0), (0, Cp - embed))).astype(mm_dtype)
        bvec = jnp.pad(b, (0, Cp - embed))
        return pallas_linear(pat, wmat, bvec, mm_dtype=mm_dtype).reshape(B, L, Cp)

    ex = patch_embed(x, params["pe1_w"], params["pe1_b"])
    eg = patch_embed(guided, params["pe2_w"], params["pe2_b"])

    for i, blk in enumerate(params["blocks"]):
        shift = 0 if i % 2 == 0 else window_size // 2
        pp = prepare_block_params(blk, embed, Cp, num_heads, window_size, mm_dtype)
        ex = swin_block_forward(ex, eg, H2, W2, pp, window_size=window_size,
                                shift_size=shift, num_heads=num_heads,
                                c_true=embed, fast_math=fast_math)

    # ConvTranspose2d(k=ps, s=ps) == matmul + depth-to-space (padded input rows are
    # zero and the padded weight rows are zero, so the result is exact).
    rw, rb = params["rec_w"], params["rec_b"]         # rw: (embed, Cout, ps, ps)
    Cout = rw.shape[1]
    wmat = rw.reshape(embed, Cout * ps * ps)
    wmat = jnp.pad(wmat, ((0, Cp - embed), (0, 0))).astype(mm_dtype)
    brep = jnp.repeat(rb, ps * ps)                    # matches (o, kh, kw) column order
    y2d = pallas_linear(ex.reshape(B * L, Cp), wmat, brep, mm_dtype=mm_dtype)
    y = (y2d.reshape(B, H2, W2, Cout, ps, ps)
            .transpose(0, 3, 1, 4, 2, 5)
            .reshape(B, Cout, H, W))
    return y


# --------------------------- pure-JAX reference --------------------------------

def reference_block(x, guided, H, W, p, *, window_size, shift_size, num_heads):
    B, L, C = x.shape
    ws = window_size
    N = ws * ws
    hd = C // num_heads
    scale = hd ** -0.5

    def ln(v, g, b):
        mu = jnp.mean(v, -1, keepdims=True)
        var = jnp.mean(jnp.square(v - mu), -1, keepdims=True)
        return (v - mu) / jnp.sqrt(var + 1e-5) * g + b

    shortcut = x
    xn = ln(x, p["n1g"], p["n1b"]).reshape(B, H, W, C)
    gn = ln(guided, p["n1g"], p["n1b"]).reshape(B, H, W, C)
    if shift_size > 0:
        xn = jnp.roll(xn, (-shift_size, -shift_size), (1, 2))
        gn = jnp.roll(gn, (-shift_size, -shift_size), (1, 2))
        mask = create_attn_mask(H, W, ws, shift_size)
    else:
        mask = None
    xw = window_partition(xn, ws).reshape(-1, N, C)
    gw = window_partition(gn, ws).reshape(-1, N, C)
    B_ = xw.shape[0]
    nW = (H // ws) * (W // ws)

    q = (xw @ p["wq"] + p["bq"]).reshape(B_, N, num_heads, hd).transpose(0, 2, 1, 3)
    kv = (gw @ p["wkv"] + p["bkv"]).reshape(B_, N, 2, num_heads, hd).transpose(2, 0, 3, 1, 4)
    k, v = kv[0], kv[1]
    attn = (q * scale) @ k.transpose(0, 1, 3, 2)
    rpi = relative_position_index(ws).reshape(-1)
    relb = p["rpb_table"][rpi].reshape(N, N, num_heads).transpose(2, 0, 1)
    attn = attn + relb[None]
    if mask is not None:
        attn = attn.reshape(B_ // nW, nW, num_heads, N, N) + mask[None, :, None]
        attn = attn.reshape(B_, num_heads, N, N)
    attn = jax.nn.softmax(attn, axis=-1)
    o = (attn @ v).transpose(0, 2, 1, 3).reshape(B_, N, C)
    o = o @ p["wp"] + p["bp"]
    o = window_reverse(o.reshape(-1, ws, ws, C), ws, H, W)
    if shift_size > 0:
        o = jnp.roll(o, (shift_size, shift_size), (1, 2))
    y = shortcut + o.reshape(B, L, C)
    yn = ln(y, p["n2g"], p["n2b"])
    h = jax.nn.gelu(yn @ p["w1"] + p["b1"], approximate=False)
    return y + (h @ p["w2"] + p["b2"])


def reference_spatial_aligner(x, guided, params, *, patch_size, window_size, num_heads):
    B, Cin, H, W = x.shape
    ps = patch_size
    H2, W2 = H // ps, W // ps
    embed = params["pe1_w"].shape[0]

    def conv_s2(img, w, b):                       # Conv2d(k=ps, s=ps), NCHW/OIHW
        xr = img.reshape(B, Cin, H2, ps, W2, ps)
        out = jnp.einsum("bchkwl,ockl->bohw", xr, w) + b[None, :, None, None]
        return out.reshape(B, embed, H2 * W2).transpose(0, 2, 1)

    ex = conv_s2(x, params["pe1_w"], params["pe1_b"])
    eg = conv_s2(guided, params["pe2_w"], params["pe2_b"])
    for i, blk in enumerate(params["blocks"]):
        shift = 0 if i % 2 == 0 else window_size // 2
        ex = reference_block(ex, eg, H2, W2, blk, window_size=window_size,
                             shift_size=shift, num_heads=num_heads)
    feat = ex.transpose(0, 2, 1).reshape(B, embed, H2, W2)
    rw, rb = params["rec_w"], params["rec_b"]
    Cout = rw.shape[1]
    y = jnp.einsum("bchw,cokl->bohkwl", feat, rw)  # ConvTranspose2d(k=ps, s=ps)
    return y.reshape(B, Cout, H, W) + rb[None, :, None, None]


# ------------------------------------ main --------------------------------------

if __name__ == "__main__":
    # Accurate pure-JAX reference matmuls (the strict kernel path is compared at 2e-3).
    jax.config.update("jax_default_matmul_precision", "highest")

    # Small config consistent with Spatial_aligner: patch_size=2, window_size=4,
    # num_heads=3, embed_dim=96; 32x32 input -> 16x16 tokens -> 32 windows of 16 tokens.
    B = 2
    in_channel = 32
    out_channel = 32
    H = W = 32
    patch_size = 2
    window_size = 4
    num_heads = 3
    embed_dim = 96
    mlp_hidden = embed_dim * 4

    key = jax.random.PRNGKey(0)
    ks = iter(jax.random.split(key, 64))

    def nrm(shape, scale):
        return jax.random.normal(next(ks), shape, jnp.float32) * scale

    params = {
        "pe1_w": nrm((embed_dim, in_channel, patch_size, patch_size), 0.05),
        "pe1_b": nrm((embed_dim,), 0.01),
        "pe2_w": nrm((embed_dim, in_channel, patch_size, patch_size), 0.05),
        "pe2_b": nrm((embed_dim,), 0.01),
        "rec_w": nrm((embed_dim, out_channel, patch_size, patch_size), 0.05),
        "rec_b": nrm((out_channel,), 0.01),
    }

    def make_block_params():
        return {
            "n1g": 1.0 + nrm((embed_dim,), 0.1),
            "n1b": nrm((embed_dim,), 0.1),
            "n2g": 1.0 + nrm((embed_dim,), 0.1),
            "n2b": nrm((embed_dim,), 0.1),
            "wq":  nrm((embed_dim, embed_dim), 0.05),
            "bq":  nrm((embed_dim,), 0.01),
            "wkv": nrm((embed_dim, 2 * embed_dim), 0.05),
            "bkv": nrm((2 * embed_dim,), 0.01),
            "wp":  nrm((embed_dim, embed_dim), 0.05),
            "bp":  nrm((embed_dim,), 0.01),
            "w1":  nrm((embed_dim, mlp_hidden), 0.05),
            "b1":  nrm((mlp_hidden,), 0.01),
            "w2":  nrm((mlp_hidden, embed_dim), 0.05),
            "b2":  nrm((embed_dim,), 0.01),
            "rpb_table": nrm(((2 * window_size - 1) ** 2, num_heads), 0.02),
        }

    params["blocks"] = [make_block_params() for _ in range(2)]

    x = jax.random.normal(next(ks), (B, in_channel, H, W), jnp.float32)
    guided = jax.random.normal(next(ks), (B, in_channel, H, W), jnp.float32)

    ref = jax.block_until_ready(
        reference_spatial_aligner(x, guided, params, patch_size=patch_size,
                                  window_size=window_size, num_heads=num_heads))

    # 1) strict numerics: all-f32 kernel path vs pure-JAX reference.
    out_f32 = jax.block_until_ready(
        spatial_aligner_forward(x, guided, params, patch_size=patch_size,
                                window_size=window_size, num_heads=num_heads,
                                fast_math=False))
    assert out_f32.shape == (B, out_channel, H, W)
    np.testing.assert_allclose(np.asarray(out_f32), np.asarray(ref),
                               atol=2e-3, rtol=2e-3)

    # 2) fast-math path (bf16 MXU operands + approx softmax reciprocal), looser tol.
    out_fast = jax.block_until_ready(
        spatial_aligner_forward(x, guided, params, patch_size=patch_size,
                                window_size=window_size, num_heads=num_heads,
                                fast_math=True))
    np.testing.assert_allclose(np.asarray(out_fast), np.asarray(ref),
                               atol=6e-2, rtol=6e-2)

    print("KERNEL_OK")
</pallas_src>

<mosaic_0001>
module attributes {stable_mosaic.version = 11 : i64} {
  func.func @k(%arg0: i32, %arg1: memref<8x128xf32, #tpu.memory_space<vmem>>, %arg2: memref<8x128xf32, #tpu.memory_space<vmem>>, %arg3: memref<8x128xf32, #tpu.memory_space<vmem>>) attributes {dimension_semantics = [#tpu.dimension_semantics<arbitrary>], iteration_bounds = array<i64: 2>, scalar_prefetch = 0 : i64, scratch_operands = 0 : i64, tpu.core_type = #tpu.core_type<tc>, window_params = [{transform_indices = @transform_0, window_bounds = array<i64: 8, 128>}, {pipeline_mode = #tpu.pipeline_mode<synchronous>, transform_indices = @transform_1, window_bounds = array<i64: 8, 128>}, {transform_indices = @transform_2, window_bounds = array<i64: 8, 128>}]} {
    %c0 = arith.constant 0 : index
    %c0_0 = arith.constant 0 : index
    %0 = vector.load %arg1[%c0, %c0_0] : memref<8x128xf32, #tpu.memory_space<vmem>>, vector<8x128xf32>
    %c0_1 = arith.constant 0 : index
    %c0_2 = arith.constant 0 : index
    %1 = vector.load %arg2[%c0_1, %c0_2] : memref<8x128xf32, #tpu.memory_space<vmem>>, vector<8x128xf32>
    %2 = arith.addf %0, %1 : vector<8x128xf32>
    %c0_3 = arith.constant 0 : index
    %c0_4 = arith.constant 0 : index
    %3 = vector.load %arg3[%c0_3, %c0_4] : memref<8x128xf32, #tpu.memory_space<vmem>>, vector<8x128xf32>
    tpu.vector_store %arg3[%c0_3, %c0_4], %2 {strides = array<i32>} : memref<8x128xf32, #tpu.memory_space<vmem>>, vector<8x128xf32>,
    return
  }
  func.func @transform_0(%arg0: i32) -> (i32, i32) {
    %c0_i32 = arith.constant 0 : i32
    %c0_i32_0 = arith.constant 0 : i32
    return %arg0, %c0_i32 : i32, i32
  }
  func.func @transform_1(%arg0: i32) -> (i32, i32) {
    %c0_i32 = arith.constant 0 : i32
    %c0_i32_0 = arith.constant 0 : i32
    %c0_i32_1 = arith.constant 0 : i32
    return %c0_i32, %c0_i32_0 : i32, i32
  }
  func.func @transform_2(%arg0: i32) -> (i32, i32) {
    %c0_i32 = arith.constant 0 : i32
    %c0_i32_0 = arith.constant 0 : i32
    return %arg0, %c0_i32 : i32, i32
  }
}

module attributes {stable_mosaic.version = 11 : i64} {
  func.func @_linear_bias_kernel(%arg0: i32, %arg1: memref<128x128xf32, #tpu.memory_space<vmem>>, %arg2: memref<128x128xf32, #tpu.memory_space<vmem>>, %arg3: memref<1x128xf32, #tpu.memory_space<vmem>>, %arg4: memref<128x128xf32, #tpu.memory_space<vmem>>) attributes {dimension_semantics = [#tpu.dimension_semantics<parallel>], iteration_bounds = array<i64: 4>, scalar_prefetch = 0 : i64, scratch_operands = 0 : i64, tpu.core_type = #tpu.core_type<tc>, window_params = [{transform_indices = @transform_0, window_bounds = array<i64: 128, 128>}, {pipeline_mode = #tpu.pipeline_mode<synchronous>, transform_indices = @transform_1, window_bounds = array<i64: 128, 128>}, {pipeline_mode = #tpu.pipeline_mode<synchronous>, transform_indices = @transform_2, window_bounds = array<i64: 1, 128>}, {transform_indices = @transform_3, window_bounds = array<i64: 128, 128>}]} {
    %c0 = arith.constant 0 : index
    %c0_0 = arith.constant 0 : index
    %0 = vector.load %arg1[%c0, %c0_0] : memref<128x128xf32, #tpu.memory_space<vmem>>, vector<128x128xf32>
    %c0_1 = arith.constant 0 : index
    %c0_2 = arith.constant 0 : index
    %1 = vector.load %arg2[%c0_1, %c0_2] : memref<128x128xf32, #tpu.memory_space<vmem>>, vector<128x128xf32>
    %cst = arith.constant dense<0.000000e+00> : vector<128x128xf32>
    %2 = tpu.matmul %0, %1, %cst {dimension_numbers = #tpu.dot_dimension_numbers<[1], [0], [0], [1], [0, 0, 1, 1], [], []>, precision = #tpu.contract_precision<fp32>} : vector<128x128xf32>, vector<128x128xf32>, vector<128x128xf32> -> vector<128x128xf32>
    %c0_3 = arith.constant 0 : index
    %c0_4 = arith.constant 0 : index
    %3 = vector.load %arg3[%c0_3, %c0_4] : memref<1x128xf32, #tpu.memory_space<vmem>>, vector<1x128xf32>
    %4 = vector.broadcast %3 : vector<1x128xf32> to vector<128x128xf32>
    %5 = arith.addf %2, %4 : vector<128x128xf32>
    %c0_5 = arith.constant 0 : index
    %c0_6 = arith.constant 0 : index
    %6 = vector.load %arg4[%c0_5, %c0_6] : memref<128x128xf32, #tpu.memory_space<vmem>>, vector<128x128xf32>
    tpu.vector_store %arg4[%c0_5, %c0_6], %5 {strides = array<i32>} : memref<128x128xf32, #tpu.memory_space<vmem>>, vector<128x128xf32>,
    return
  }
  func.func @transform_0(%arg0: i32) -> (i32, i32) {
    %c0_i32 = arith.constant 0 : i32
    %c0_i32_0 = arith.constant 0 : i32
    return %arg0, %c0_i32 : i32, i32
  }
  func.func @transform_1(%arg0: i32) -> (i32, i32) {
    %c0_i32 = arith.constant 0 : i32
    %c0_i32_0 = arith.constant 0 : i32
    %c0_i32_1 = arith.constant 0 : i32
    return %c0_i32, %c0_i32_0 : i32, i32
  }
  func.func @transform_2(%arg0: i32) -> (i32, i32) {
    %c0_i32 = arith.constant 0 : i32
    %c0_i32_0 = arith.constant 0 : i32
    %c0_i32_1 = arith.constant 0 : i32
    return %c0_i32, %c0_i32_0 : i32, i32
  }
  func.func @transform_3(%arg0: i32) -> (i32, i32) {
    %c0_i32 = arith.constant 0 : i32
    %c0_i32_0 = arith.constant 0 : i32
    return %arg0, %c0_i32 : i32, i32
  }
}

</mosaic_0001>

<bundles_post_ra>
// kernel: tpu_custom_call.1
= control target key start
LH: loop header
LB: loop body
LE: loop exit
PB: predicated region body
PF: predicated region fallthrough
CT: control target
= control target key end

     0   :  { %7 = vsyncpa [#allocation3], 0  ;;  %s633_s0 = inlined_call_operand.hbm [shape: f32[16,128], index: 0, kind: input, shape index: {}]   ;;  %s634_s1 = inlined_call_operand.hbm [shape: f32[8,128], index: 1, kind: input, shape index: {}]   ;;  %s635_s2 = inlined_call_operand.hbm [shape: f32[16,128], index: 2, kind: output, shape index: {}]  }
   0x1   :  { %9 = vsyncpa [#allocation3 + $0x1], 0 }
   0x2   :  { %10 = vsyncpa [#allocation6], 0 }
   0x3   :  { %11 = vsyncpa [#allocation4], 0 }
   0x4   :  { %13 = vsyncpa [#allocation4 + $0x1], 0  ;;  %s495_s9 = smov 0   ;;  %s497_s10 = smov 0  }
   0x5   :  { %s499_s11 = smov 0   ;;  %s501_s12 = smov 0  }
   0x6 LB: > { %s516_s13 = sadd.s32 4294967295, %s477_s12   ;;  %s276_s14 = sadd.s32 4294967294, %s477_s12   ;;  %s477_s12 = sphi %s501_s12, %s645_s12   ;;  %s473_s11 = sphi %s499_s11, %s644_s11   ;;  %s469_s10 = sphi %s497_s10, %s643_s10   ;;  %s465_s9 = sphi %s495_s9, %s642_s9  }
   0x7   : > { %p39_p0 = scmp.ne.s32.totalorder %s469_s10, %s465_s9  ;;  %p40_p1 = scmp.eq.s32.totalorder %s516_s13, 0 }
   0x8   : > { %p84_p2 = scmp.eq.s32.totalorder %s516_s13, 1  ;;  %p90_p3 = scmp.eq.s32.totalorder %s276_s14, 1 }
   0x9   : > { %p525_p4 = por %p40_p1, %p39_p0  ;;  %p277_p5 = scmp.ge.s32.totalorder %s477_s12, 1 }
   0xa   : > { %p530_p6 = por %p90_p3, %p39_p0  ;;  %p97_p7 = scmp.lt.s32.totalorder %s477_s12, 3 }
   0xb   : > { %s109_s19 = sshll.u32 %s634_s1, 4  ;;  %s479_s21 = smov [#allocation5]   ;;  %s110_s19 = int_to_ptr.hbm [resolvable:$true] %s109_s19 }
   0xc   : > { %p538_p8 = pnand %p277_p5, %p97_p7  ;;  %s111_s22 = sshll.u32 %s479_s21, 4  ;;  %s112_s22 = int_to_ptr.vmem [resolvable:$true] %s111_s22 }
   0xd   : > { %s548_s23 = sadd.s32 1, %s477_s12   ;;  %s26_s24 = sadd.s32 1, %s473_s11 }
   0xe   : > { %p298_p10 = pneg %p538_p8  ;;  %s23_s25 = ssub.s32 %s477_s12, %s548_s23 }
   0xf   : > { %p24_p12 = scmp.eq.s32.totalorder %s23_s25, 0  ;;  %p33_p13 = scmp.ne.s32.totalorder %s473_s11, %s469_s10 }
  0x10   : > { %p299_p11 = pnand %p298_p10, %p40_p1  ;;  %p34_p0 = scmp.eq.s32.totalorder %s477_s12, 0 }
  0x11   : > { %s557_s26 = scalar_select %p24_p12, %s473_s11, %s26_s24  }
  0x12   : > { %301 = dma.hbm_to_vmem [thread:$0]  (!%p299_p11), %s110_s19, 128, %s112_s22, [#allocation6]  }
  0x13   : > { %p561_p3 = por %p84_p2, %p33_p13  ;;  %p311_p5 = scmp.lt.s32.totalorder %s477_s12, 2 }
  0x14   : > { %s122_s28 = sand.u32 1, %s473_s11   ;;  %s281_s29 = sshll.u32 %s477_s12, 3 }
  0x15   : > { %p35_p7 = por %p34_p0, %p33_p13  ;;  %s280_s30 = sshll.u32 %s122_s28, 3 }
  0x16   : > { %s130_s5 = scalar_lea.hbm %s633_s0, %s281_s29  ;;  %s126_s7 = scalar_lea.vmem [#allocation2], %s280_s30 }
  0x17   : > { %s132_s6 = sshll.u32 %s130_s5, 4  ;;  %s134_s8 = sshll.u32 %s126_s7, 4  ;;  %s133_s6 = int_to_ptr.hbm [resolvable:$true] %s132_s6  ;;  %s135_s8 = int_to_ptr.vmem [resolvable:$true] %s134_s8 }
  0x18   : > { %p571_p10 = pnand %p311_p5, %p35_p7  ;;  %s123_s17 = scalar_lea.sflag [#allocation3], %s122_s28 }
  0x19   : > { %s377_s18 = sshra.s32 %s133_s6, 4  ;;  %s384_s24 = scalar_lea.hbm %s633_s0, 16  ;;  %s378_s18 = int_to_ptr.hbm [resolvable:$true] %s377_s18 }
  0x1a   : > { %s379_s19 = scalar_lea.hbm %s378_s18, 8  ;;  %p381_p11 = pneg %p571_p10 }
  0x1b   : > { %p380_p2 = scmp.ne.s32.totalorder %s378_s18, %s379_s19  ;;  %p385_p0 = scmp.lt.s32.totalorder %s378_s18, %s633_s0 }
  0x1c   : > { %p386_p5 = scmp.lt.s32.totalorder %s384_s24, %s379_s19 }
  0x1d   : > { %p382_p12 = pnand %p381_p11, %p380_p2 }
  0x1e   : > { %p387_p7 = por %p386_p5, %p385_p0 }
  0x1f   : > { %p383_p13 = pneg %p382_p12 }
  0x21   : > { %p388_p9 = pnand %p387_p7, %p383_p13 }
  0x23   : > { %391 = shalt.err (!%p388_p9)
}
  0x24   : > { %305 = dma.hbm_to_vmem [thread:$0]  (!%p571_p10), %s133_s6, 128, %s135_s8, %s123_s17  }
  0x25   : > { %143 = sbr.rel (%p538_p8) target bundleno = 60 (0x3c), region = 28  ;;  %s588_s28 = sand.u32 (!%p538_p8), 1, %s469_s10  }
  0x26   : > { %s283_s30 = sshll.u32 (!%p538_p8), %s588_s28, 3  ;;  %s146_s3 = scalar_lea.sflag (!%p538_p8), [#allocation3], %s588_s28 }
  0x27   : > { %s149_s4 = scalar_lea.vmem (!%p538_p8), [#allocation2], %s283_s30 }
  0x2a   : > { %452 = dma.done.wait (%p525_p4), %s146_s3, 128  }
  0x2b   : > { %454 = vsyncadd (%p525_p4), %s146_s3, 4294967168 }
  0x2c   : > { %456 = dma.done.wait (%p40_p1), [#allocation6], 128  }
  0x2d   : > { %458 = vsyncadd (%p40_p1), [#allocation6], 4294967168  ;;  %s287_s20 = sshll.u32 %s516_s13, 3  ;;  %s175_s8 = scalar_lea.vmem [#allocation7], %s283_s30  ;;  %v176_v0 = vld [vmem:[%s149_s4] sm:$0xff]  ;;  %v177_v1 = vld [vmem:[#allocation5] sm:$0xff] }
  0x2e   : > { %s191_s7 = scalar_lea.hbm %s635_s2, %s287_s20  ;;  %s193_s14 = sshll.u32 %s175_s8, 4  ;;  %v178_v2 = vadd.f32 %v177_v1, %v176_v0  ;;  %s194_s14 = int_to_ptr.vmem [resolvable:$true] %s193_s14 }
  0x2f   : > { %s195_s17 = sshll.u32 %s191_s7, 4  ;;  %s181_s15 = scalar_lea.sflag [#allocation4], %s588_s28  ;;  %s196_s17 = int_to_ptr.hbm [resolvable:$true] %s195_s17 }
  0x30   : > { %179 = vst [vmem:[%s175_s8] sm:$0xff] %v178_v2  ;;  %s421_s18 = sshra.s32 %s196_s17, 4  ;;  %s427_s22 = scalar_lea.hbm %s635_s2, 16  ;;  %s422_s18 = int_to_ptr.hbm [resolvable:$true] %s421_s18 }
  0x31   : > { %s423_s19 = scalar_lea.hbm %s422_s18, 8  ;;  %p428_p9 = scmp.lt.s32.totalorder %s422_s18, %s635_s2 }
  0x32   : > { %p424_p1 = scmp.ne.s32.totalorder %s422_s18, %s423_s19  ;;  %p429_p10 = scmp.lt.s32.totalorder %s427_s22, %s423_s19 }
  0x34   : > { %p425_p4 = pnand %p424_p1, %p561_p3  ;;  %p430_p2 = por %p429_p10, %p428_p9 }
  0x36   : > { %p426_p8 = pneg %p425_p4 }
  0x38   : > { %p431_p11 = pnand %p430_p2, %p426_p8 }
  0x3a   : > { %434 = shalt.err (!%p431_p11)
}
  0x3b   : > { %296 = dma.vmem_to_hbm [thread:$0]  (%p561_p3), %s194_s14, 128, %s196_s17, %s181_s15  }
  0x3c PF: > { %s207_s29 = sand.u32 1, %s465_s9   ;;  %p641_p12 = scmp.ge.s32.totalorder %s477_s12, 2 }
  0x3d   : > { %s208_s28 = scalar_lea.sflag [#allocation4], %s207_s29 }
  0x3e   : > { %p307_p13 = pnand %p641_p12, %p530_p6 }
  0x40   : > { %p308_p0 = pneg %p307_p13 }
  0x42   : > { %460 = dma.done.wait (%p308_p0), %s208_s28, 128  }
  0x43   : > { %462 = vsyncadd (%p308_p0), %s208_s28, 4294967168  ;;  %p16_p5 = scmp.ge.s32.totalorder %s548_s23, 4   ;;  %s642_s9 = smov %s469_s10 }
  0x44   : > { %s643_s10 = smov %s473_s11  ;;  %s644_s11 = smov %s557_s26 }
  0x45   : > { %s645_s12 = smov %s548_s23  ;;  %18 = sbr.rel (!%p16_p5) target bundleno = 6 (0x6), region = 77 }
  0x4a   :  { %214 = vsyncpa [#allocation3], 1 }
  0x4b   :  { %216 = vsyncpa [#allocation3 + $0x1], 1 }
  0x4c   :  { %217 = vsyncpa [#allocation6], 1 }
  0x4d   :  { %218 = vsyncpa [#allocation4], 1 }
  0x4e   :  { %220 = vsyncpa [#allocation4 + $0x1], 1 }

// kernel: tpu_custom_call.1
= control target key start
LH: loop header
LB: loop body
LE: loop exit
PB: predicated region body
PF: predicated region fallthrough
CT: control target
= control target key end

     0   :  { %8 = vsyncpa [#allocation3], 0  ;;  %s2195_s0 = inlined_call_operand.hbm [shape: f32[512,128], index: 0, kind: input, shape index: {}]   ;;  %s2196_s1 = inlined_call_operand.hbm [shape: f32[128,128], index: 1, kind: input, shape index: {}]   ;;  %s2197_s2 = inlined_call_operand.vmem [shape: f32[1,128], index: 2, kind: input, shape index: {}]   ;;  %s2198_s3 = inlined_call_operand.hbm [shape: f32[512,128], index: 3, kind: output, shape index: {}]  }
   0x1   :  { %10 = vsyncpa [#allocation3 + $0x1], 0 }
   0x2   :  { %11 = vsyncpa [#allocation6], 0 }
   0x3   :  { %12 = vsyncpa [#allocation4], 0 }
   0x4   :  { %14 = vsyncpa [#allocation4 + $0x1], 0  ;;  %s1436_s12 = smov 0   ;;  %s1438_s13 = smov 0  }
   0x5   :  { %s1440_s14 = smov 0   ;;  %s1442_s15 = smov 0  }
   0x6 LB: > { %s1457_s16 = sadd.s32 4294967295, %s1409_s15   ;;  %s1167_s17 = sadd.s32 4294967294, %s1409_s15   ;;  %s1409_s15 = sphi %s1442_s15, %s2233_s15   ;;  %s1405_s14 = sphi %s1440_s14, %s2232_s14   ;;  %s1401_s13 = sphi %s1438_s13, %s2231_s13   ;;  %s1397_s12 = sphi %s1436_s12, %s2230_s12  }
   0x7   : > { %p40_p0 = scmp.ne.s32.totalorder %s1401_s13, %s1397_s12  ;;  %p41_p1 = scmp.eq.s32.totalorder %s1457_s16, 0 }
   0x8   : > { %p106_p2 = scmp.eq.s32.totalorder %s1457_s16, 3  ;;  %p112_p3 = scmp.eq.s32.totalorder %s1167_s17, 3 }
   0x9   : > { %p1466_p4 = por %p41_p1, %p40_p0  ;;  %p1168_p5 = scmp.ge.s32.totalorder %s1409_s15, 1 }
   0xa   : > { %p1471_p6 = por %p112_p3, %p40_p0  ;;  %p119_p7 = scmp.lt.s32.totalorder %s1409_s15, 5 }
   0xb   : > { %s130_s22 = sshll.u32 %s2196_s1, 4  ;;  %s1411_s24 = smov [#allocation5]   ;;  %s131_s22 = int_to_ptr.hbm [resolvable:$true] %s130_s22 }
   0xc   : > { %p1479_p8 = pnand %p1168_p5, %p119_p7  ;;  %s132_s25 = sshll.u32 %s1411_s24, 4  ;;  %s133_s25 = int_to_ptr.vmem [resolvable:$true] %s132_s25 }
   0xd   : > { %s1488_s26 = sadd.s32 1, %s1409_s15   ;;  %s1412_s27 = smov 128  }
   0xe   : > { %p1225_p9 = pneg %p1479_p8  ;;  %s1413_s28 = smov 8  }
   0xf   : > { %s24_s29 = ssub.s32 %s1409_s15, %s1488_s26  ;;  %s27_s30 = sadd.s32 1, %s1405_s14 }
  0x10   : > { %p1226_p10 = pnand %p1225_p9, %p41_p1  ;;  %p25_p11 = scmp.eq.s32.totalorder %s24_s29, 0 }
  0x11   : > { %p34_p12 = scmp.ne.s32.totalorder %s1405_s14, %s1401_s13  ;;  %p35_p13 = scmp.eq.s32.totalorder %s1409_s15, 0 }
  0x12   : > { %1228 = dma.hbm_to_vmem [thread:$0]  (!%p1226_p10), %s131_s22, 2048, %s133_s25, [#allocation6], %s1412_s27, %s1412_s27, %s1413_s28  }
  0x13   : > { %s1500_s4 = scalar_select %p25_p11, %s1405_s14, %s27_s30  }
  0x14   : > { %p1504_p0 = por %p106_p2, %p34_p12  ;;  %p1238_p3 = scmp.lt.s32.totalorder %s1409_s15, 4 }
  0x15   : > { %s149_s6 = sand.u32 1, %s1405_s14   ;;  %s1183_s7 = sshll.u32 %s1409_s15, 7 }
  0x16   : > { %p36_p5 = por %p35_p13, %p34_p12  ;;  %s1171_s8 = sshll.u32 %s149_s6, 7 }
  0x17   : > { %s158_s11 = scalar_lea.hbm %s2195_s0, %s1183_s7  ;;  %s153_s20 = scalar_lea.vmem [#allocation2], %s1171_s8 }
  0x18   : > { %s159_s17 = sshll.u32 %s158_s11, 4  ;;  %s161_s21 = sshll.u32 %s153_s20, 4  ;;  %s160_s17 = int_to_ptr.hbm [resolvable:$true] %s159_s17  ;;  %s162_s21 = int_to_ptr.vmem [resolvable:$true] %s161_s21 }
  0x19   : > { %p1514_p7 = pnand %p1238_p3, %p36_p5  ;;  %s150_s24 = scalar_lea.sflag [#allocation3], %s149_s6 }
  0x1a   : > { %s1309_s25 = sshra.s32 %s160_s17, 4  ;;  %s1316_s8 = scalar_lea.hbm %s2195_s0, 512  ;;  %s1310_s25 = int_to_ptr.hbm [resolvable:$true] %s1309_s25 }
  0x1b   : > { %s1311_s29 = scalar_lea.hbm %s1310_s25, 128  ;;  %p1313_p9 = pneg %p1514_p7 }
  0x1c   : > { %p1312_p2 = scmp.ne.s32.totalorder %s1310_s25, %s1311_s29  ;;  %p1317_p12 = scmp.lt.s32.totalorder %s1310_s25, %s2195_s0 }
  0x1d   : > { %p1318_p13 = scmp.lt.s32.totalorder %s1316_s8, %s1311_s29 }
  0x1e   : > { %p1314_p10 = pnand %p1313_p9, %p1312_p2 }
  0x1f   : > { %p1319_p3 = por %p1318_p13, %p1317_p12 }
  0x20   : > { %p1315_p11 = pneg %p1314_p10 }
  0x22   : > { %p1320_p5 = pnand %p1319_p3, %p1315_p11 }
  0x24   : > { %1323 = shalt.err (!%p1320_p5)
}
  0x25   : > { %1232 = dma.hbm_to_vmem [thread:$0]  (!%p1514_p7), %s160_s17, 2048, %s162_s21, %s150_s24, %s1412_s27, %s1412_s27, %s1413_s28  }
  0x26   : > { %173 = sbr.rel (%p1479_p8) target bundleno = 414 (0x19e), region = 32  ;;  %s1534_s6 = sand.u32 (!%p1479_p8), 1, %s1401_s13  }
  0x27   : > { %s1175_s11 = sshll.u32 (!%p1479_p8), %s1534_s6, 7  ;;  %s176_s20 = scalar_lea.sflag (!%p1479_p8), [#allocation3], %s1534_s6 }
  0x28   : > { %s1540_s25 = scalar_lea.vmem (!%p1479_p8), [#allocation2], %s1175_s11 }
  0x2b   : > { %1384 = dma.done.wait (%p1466_p4), %s176_s20, 2048  }
  0x2c   : > { %1386 = vsyncadd (%p1466_p4), %s176_s20, 4294965248 }
  0x2d   : > { %1388 = dma.done.wait (%p41_p1), [#allocation6], 2048  }
  0x2e   : > { %1390 = vsyncadd (%p41_p1), [#allocation6], 4294965248  ;;  %v241_v0 = vld [vmem:[#allocation5 + $0x78] sm:$0xff]  ;;  %v240_v1 = vld [vmem:[#allocation5 + $0x70] sm:$0xff]  ;;  %s2118_s27 = scalar_lea.vmem [#allocation7], %s1175_s11  ;;  %s1184_s28 = sshll.u32 %s1457_s16, 7 }
  0x2f   : > { %v239_v2 = vld [vmem:[#allocation5 + $0x68] sm:$0xff]  ;;  %v1550_v3 = vand.u32 4294901760, %v241_v0  ;;  %v1552_v4 = vand.u32 4294901760, %v240_v1  ;;  %v238_v6 = vld [vmem:[#allocation5 + $0x60] sm:$0xff]  ;;  %v237_v7 = vld [vmem:[#allocation5 + $0x58] sm:$0xff]  ;;  %s1080_s22 = scalar_lea.hbm %s2198_s3, %s1184_s28  ;;  %s1081_s24 = sshll.u32 %s2118_s27, 4  ;;  %s1082_s24 = int_to_ptr.vmem [resolvable:$true] %s1081_s24 }
  0x30   : > { %v1554_v5 = vand.u32 4294901760, %v239_v2  ;;  %v236_v8 = vld [vmem:[#allocation5 + $0x50] sm:$0xff]  ;;  %v1556_v9 = vand.u32 4294901760, %v238_v6  ;;  %v1558_v10 = vand.u32 4294901760, %v237_v7  ;;  %v235_v12 = vld [vmem:[#allocation5 + $0x48] sm:$0xff]  ;;  %v234_v13 = vld [vmem:[#allocation5 + $0x40] sm:$0xff] }
  0x31   : > { %v1560_v11 = vand.u32 4294901760, %v236_v8  ;;  %1185 = vmatpush.msra.mxu2 %v1550_v3  ;;  %v1564_v14 = vsub.f32 %v241_v0, %v1550_v3  ;;  %v1567_v15 = vsub.f32 %v240_v1, %v1552_v4  ;;  %247 = vmatpush.msra.mxu0 %v1550_v3  ;;  %v233_v17 = vld [vmem:[#allocation5 + $0x38] sm:$0xff]  ;;  %v1573_v18 = vand.u32 4294901760, %v235_v12  ;;  %v232_v25 = vld [vmem:[#allocation5 + $0x30] sm:$0xff]  ;;  %v231_v33 = vld [vmem:[#allocation5 + $0x28] sm:$0xff]  ;;  %s1083_s29 = sshll.u32 %s1080_s22, 4  ;;  %s1084_s29 = int_to_ptr.hbm [resolvable:$true] %s1083_s29 }
  0x32   : > { %v1570_v16 = vsub.f32 %v239_v2, %v1554_v5  ;;  %v1576_v19 = vsub.f32 %v238_v6, %v1556_v9  ;;  %v1579_v20 = vsub.f32 %v237_v7, %v1558_v10  ;;  %v1585_v24 = vand.u32 4294901760, %v234_v13  ;;  %v230_v42 = vld [vmem:[#allocation5 + $0x20] sm:$0xff]  ;;  %v229_v49 = vld [vmem:[#allocation5 + $0x18] sm:$0xff]  ;;  %v228_v55 = vld [vmem:[#allocation5 + $0x10] sm:$0xff]  ;;  %s1069_s16 = scalar_lea.sflag [#allocation4], %s1534_s6  ;;  %s1353_s30 = sshra.s32 %s1084_s29, 4  ;;  %s1354_s30 = int_to_ptr.hbm [resolvable:$true] %s1353_s30 }
  0x33   : > { %1186 = vmatpush.msra.mxu2 %v1552_v4  ;;  %v409_v21 = vand.u32 4294901760, %v1564_v14  ;;  %v415_v22 = vand.u32 4294901760, %v1567_v15  ;;  %249 = vmatpush.msra.mxu0 %v1552_v4  ;;  %v1589_v27 = vand.u32 4294901760, %v233_v17  ;;  %v1592_v28 = vsub.f32 %v236_v8, %v1560_v11  ;;  %v218_v47 = vld [vmem:[%s1540_s25 + $0x40] sm:$0xff]  ;;  %v227_v62 = vld [vmem:[#allocation5 + $0x8] sm:$0xff]  ;;  %s1355_s7 = scalar_lea.hbm %s1354_s30, 128  ;;  %p1360_p7 = scmp.lt.s32.totalorder %s1354_s30, %s2198_s3 }
  0x34   : > { %v421_v23 = vand.u32 4294901760, %v1570_v16  ;;  %v427_v26 = vand.u32 4294901760, %v1576_v19  ;;  %v433_v32 = vand.u32 4294901760, %v1579_v20  ;;  %v1609_v35 = vand.u32 4294901760, %v232_v25  ;;  %v226_v2 = vld [vmem:[#allocation5] sm:$0xff]  ;;  %p1356_p1 = scmp.ne.s32.totalorder %s1354_s30, %s1355_s7  ;;  %s1359_s10 = scalar_lea.hbm %s2198_s3, 512 }
  0x35   : > { %1187 = vmatpush.msra.mxu2 %v1554_v5  ;;  %v410_v29 = vsub.f32 %v1564_v14, %v409_v21  ;;  %v416_v30 = vsub.f32 %v1567_v15, %v415_v22  ;;  %251 = vmatpush.msra.mxu0 %v1554_v5  ;;  %v1612_v36 = vsub.f32 %v235_v12, %v1573_v18  ;;  %v2210_v39 = vand.u32 4294901760, %v1592_v28  ;;  %v210_v12 = vld [vmem:[%s1540_s25] sm:$0xff]  ;;  %p1361_p2 = scmp.lt.s32.totalorder %s1359_s10, %s1355_s7 }
  0x36   : > { %v422_v31 = vsub.f32 %v1570_v16, %v421_v23  ;;  %v428_v34 = vsub.f32 %v1576_v19, %v427_v26  ;;  %v1618_v40 = vsub.f32 %v234_v13, %v1585_v24  ;;  %v1620_v41 = vand.u32 4294901760, %v231_v33  ;;  %p1357_p4 = pnand %p1356_p1, %p1504_p0 }
  0x37   : > { %1188 = vmatpush.msra.mxu2 %v1556_v9  ;;  %v411_v37 = vand.u32 4294901760, %v410_v29  ;;  %v417_v38 = vand.u32 4294901760, %v416_v30  ;;  %253 = vmatpush.msra.mxu0 %v1556_v9  ;;  %v434_v44 = vsub.f32 %v1579_v20, %v433_v32  ;;  %v2209_v45 = vand.u32 4294901760, %v1612_v36  ;;  %v219_v30 = vld [vmem:[%s1540_s25 + $0x48] sm:$0xff]  ;;  %p1362_p9 = por %p1361_p2, %p1360_p7 }
  0x38   : > { %v423_v43 = vand.u32 4294901760, %v422_v31  ;;  %v1628_v46 = vsub.f32 %v233_v17, %v1589_v27  ;;  %v2207_v48 = vand.u32 4294901760, %v1618_v40  ;;  %v429_v50 = vand.u32 4294901760, %v428_v34  ;;  %p1358_p8 = pneg %p1357_p4 }
  0x39   : > { %1189 = vmatpush.msra.mxu2 %v1558_v10  ;;  %1201 = vmatpush.msra.mxu3 %v411_v37  ;;  %v440_v51 = vsub.f32 %v1592_v28, %v2210_v39  ;;  %v1637_v52 = vand.u32 4294901760, %v230_v42  ;;  %v1640_v53 = vsub.f32 %v232_v25, %v1609_v35  ;;  %v1644_v56 = vand.u32 4294901760, %v218_v47 }
  0x3a   : > { %412 = vmatpush.msra.mxu1 %v411_v37  ;;  %255 = vmatpush.msra.mxu0 %v1558_v10  ;;  %v2203_v54 = vand.u32 4294901760, %v1628_v46  ;;  %v435_v57 = vand.u32 4294901760, %v434_v44  ;;  %v446_v58 = vsub.f32 %v1612_v36, %v2209_v45  ;;  %v1650_v59 = vand.u32 4294901760, %v229_v49  ;;  %v221_v45 = vld [vmem:[%s1540_s25 + $0x58] sm:$0xff]  ;;  %p1363_p10 = pnand %p1362_p9, %p1358_p8 }
  0x3b   : > { %1190 = vmatpush.msra.mxu2 %v1560_v11  ;;  %1202 = vmatpush.msra.mxu3 %v417_v38  ;;  %v1653_v60 = vsub.f32 %v231_v33, %v1620_v41  ;;  %v452_v61 = vsub.f32 %v1618_v40, %v2207_v48  ;;  %v441_v63 = vand.u32 4294901760, %v440_v51  ;;  %v1660_v0 = vand.u32 4294901760, %v228_v55 }
  0x3c   : > { %418 = vmatpush.msra.mxu1 %v417_v38  ;;  %257 = vmatpush.msra.mxu0 %v1560_v11  ;;  %v2202_v1 = vand.u32 4294901760, %v1640_v53  ;;  %v1664_v6 = vsub.f32 %v230_v42, %v1637_v52  ;;  %v458_v7 = vsub.f32 %v1628_v46, %v2203_v54  ;;  %v1671_v8 = vsub.f32 %v218_v47, %v1644_v56 }
  0x3d   : > { %1191 = vmatpush.msra.mxu2 %v1573_v18  ;;  %1203 = vmatpush.msra.mxu3 %v423_v43  ;;  %v447_v13 = vand.u32 4294901760, %v446_v58  ;;  %v1675_v17 = vand.u32 4294901760, %v227_v62  ;;  %v2199_v25 = vand.u32 4294901760, %v1653_v60  ;;  %v1679_v29 = vsub.f32 %v229_v49, %v1650_v59 }
  0x3e   : > { %424 = vmatpush.msra.mxu1 %v423_v43  ;;  %259 = vmatpush.msra.mxu0 %v1573_v18  ;;  %v453_v31 = vand.u32 4294901760, %v452_v61  ;;  %v1682_v33 = vand.u32 4294901760, %v226_v2  ;;  %v464_v34 = vsub.f32 %v1640_v53, %v2202_v1  ;;  %v2200_v37 = vand.u32 4294901760, %v1664_v6 }
  0x3f   : > { %1192 = vmatpush.msra.mxu2 %v1585_v24  ;;  %1204 = vmatpush.msra.mxu3 %v429_v50  ;;  %v1691_v38 = vsub.f32 %v228_v55, %v1660_v0  ;;  %v1693_v42 = vand.u32 4294901760, %v210_v12  ;;  %v459_v43 = vand.u32 4294901760, %v458_v7  ;;  %v2201_v44 = vand.u32 4294901760, %v1671_v8 }
  0x40   : > { %430 = vmatpush.msra.mxu1 %v429_v50  ;;  %261 = vmatpush.msra.mxu0 %v1585_v24  ;;  %v1697_v47 = vand.u32 4294901760, %v219_v30  ;;  %v470_v49 = vsub.f32 %v1653_v60, %v2199_v25  ;;  %v2204_v50 = vand.u32 4294901760, %v1679_v29  ;;  %v1705_v51 = vsub.f32 %v227_v62, %v1675_v17 }
  0x41   : > { %1193 = vmatpush.msra.mxu2 %v1589_v27  ;;  %1205 = vmatpush.msra.mxu3 %v435_v57  ;;  %v1708_v55 = vsub.f32 %v210_v12, %v1693_v42  ;;  %v465_v58 = vand.u32 4294901760, %v464_v34  ;;  %v476_v61 = vsub.f32 %v1664_v6, %v2200_v37  ;;  %v1718_v62 = vsub.f32 %v226_v2, %v1682_v33  ;;  %v220_v34 = vld [vmem:[%s1540_s25 + $0x50] sm:$0xff] }
  0x42   : > { %436 = vmatpush.msra.mxu1 %v435_v57  ;;  %263 = vmatpush.msra.mxu0 %v1589_v27  ;;  %v211_v57 = vld [vmem:[%s1540_s25 + $0x8] sm:$0xff]  ;;  %v345_v7 = vsub.f32 %v1671_v8, %v2201_v44  ;;  %v1725_v12 = vsub.f32 %v219_v30, %v1697_v47  ;;  %v471_v2 = vand.u32 4294901760, %v470_v49  ;;  %v482_v37 = vsub.f32 %v1679_v29, %v2204_v50 }
  0x43   : > { %1194 = vmatpush.msra.mxu2 %v1609_v35  ;;  %1206 = vmatpush.msra.mxu3 %v441_v63  ;;  %v1729_v25 = vand.u32 4294901760, %v211_v57  ;;  %v477_v30 = vand.u32 4294901760, %v476_v61  ;;  %v499_v49 = vand.u32 4294901760, %v1718_v62  ;;  %v1742_v1 = vand.u32 4294901760, %v220_v34 }
  0x44   : > { %442 = vmatpush.msra.mxu1 %v441_v63  ;;  %265 = vmatpush.msra.mxu0 %v1609_v35  ;;  %v2205_v63 = vand.u32 4294901760, %v1691_v38  ;;  %v346_v54 = vand.u32 4294901760, %v345_v7  ;;  %v2211_v50 = vand.u32 4294901760, %v1725_v12  ;;  %v212_v7 = vld [vmem:[%s1540_s25 + $0x10] sm:$0xff] }
  0x45   : > { %1195 = vmatpush.msra.mxu2 %v1620_v41  ;;  %1207 = vmatpush.msra.mxu3 %v447_v13  ;;  %v1750_v61 = vsub.f32 %v211_v57, %v1729_v25  ;;  %v500_v57 = vsub.f32 %v1718_v62, %v499_v49  ;;  %v1763_v48 = vsub.f32 %v220_v34, %v1742_v1  ;;  %v1770_v39 = vand.u32 4294901760, %v212_v7 }
  0x46   : > { %448 = vmatpush.msra.mxu1 %v447_v13  ;;  %267 = vmatpush.msra.mxu0 %v1620_v41  ;;  %v2206_v13 = vand.u32 4294901760, %v1708_v55  ;;  %v488_v44 = vsub.f32 %v1691_v38, %v2205_v63  ;;  %v483_v63 = vand.u32 4294901760, %v482_v37  ;;  %v353_v37 = vsub.f32 %v1725_v12, %v2211_v50 }
  0x47   : > { %1196 = vmatpush.msra.mxu2 %v1637_v52  ;;  %1208 = vmatpush.msra.mxu3 %v453_v31  ;;  %v1775_v34 = vand.u32 4294901760, %v221_v45 }
  0x48   : > { %454 = vmatpush.msra.mxu1 %v453_v31  ;;  %269 = vmatpush.msra.mxu0 %v1637_v52  ;;  %v2208_v31 = vand.u32 4294901760, %v1705_v51 }
  0x49   : > { %1197 = vmatpush.msra.mxu2 %v1650_v59  ;;  %1209 = vmatpush.msra.mxu3 %v459_v43 }
  0x4a   : > { %460 = vmatpush.msra.mxu1 %v459_v43  ;;  %271 = vmatpush.msra.mxu0 %v1650_v59  ;;  %v281_v43 = vsub.f32 %v1708_v55, %v2206_v13  ;;  %v489_v13 = vand.u32 4294901760, %v488_v44 }
  0x4b   : > { %1198 = vmatpush.msra.mxu2 %v1660_v0  ;;  %1210 = vmatpush.msra.mxu3 %v465_v58 }
  0x4c   : > { %466 = vmatpush.msra.mxu1 %v465_v58  ;;  %273 = vmatpush.msra.mxu0 %v1660_v0  ;;  %v494_v58 = vsub.f32 %v1705_v51, %v2208_v31  ;;  %v288_v31 = vand.u32 4294901760, %v1750_v61 }
  0x4d   : > { %1199 = vmatpush.msra.mxu2 %v1675_v17  ;;  %1211 = vmatpush.msra.mxu3 %v471_v2 }
  0x4e   : > { %472 = vmatpush.msra.mxu1 %v471_v2  ;;  %275 = vmatpush.msra.mxu0 %v1675_v17  ;;  %v282_v2 = vand.u32 4294901760, %v281_v43  ;;  %v495_v44 = vand.u32 4294901760, %v494_v58  ;;  %v360_v43 = vand.u32 4294901760, %v1763_v48  ;;  %v289_v58 = vsub.f32 %v1750_v61, %v288_v31 }
  0x4f   : > { %1200 = vmatpush.msra.mxu2 %v1682_v33  ;;  %1212 = vmatpush.msra.mxu3 %v477_v30 }
  0x50   : > { %347 = vmatmul.f32.vlgmr.msra.gmra.mxu2 %v346_v54  ;;  %478 = vmatpush.msra.mxu1 %v477_v30  ;;  %v501_v54 = vand.u32 4294901760, %v500_v57  ;;  %v354_v30 = vand.u32 4294901760, %v353_v37  ;;  %v213_v57 = vld [vmem:[%s1540_s25 + $0x18] sm:$0xff]  ;;  %v290_v37 = vand.u32 4294901760, %v289_v58 }
  0x51   : > { %1213 = vmatpush.msra.mxu3 %v483_v63  ;;  %570 = vmatpush.msrb.mxu2 %v1564_v14  ;;  %v1798_v50 = vand.u32 4294901760, %v213_v57 }
  0x52   : > { %484 = vmatpush.msra.mxu1 %v483_v63  ;;  %277 = vmatpush.msra.mxu0 %v1682_v33  ;;  %v1782_v63 = vsub.f32 %v212_v7, %v1770_v39  ;;  %v361_v7 = vsub.f32 %v1763_v48, %v360_v43 }
  0x53   : > { %1214 = vmatpush.msra.mxu3 %v489_v13  ;;  %573 = vmatpush.msrb.mxu2 %v1567_v15 }
  0x54   : > { %490 = vmatpush.msra.mxu1 %v489_v13  ;;  %283 = vmatmul.f32.vlgmr.msra.gmra.mxu0 %v282_v2  ;;  %v1790_v13 = vsub.f32 %v221_v45, %v1775_v34  ;;  %v296_v2 = vand.u32 4294901760, %v1782_v63 }
  0x55   : > { %1215 = vmatpush.msra.mxu3 %v495_v44  ;;  %576 = vmatpush.msrb.mxu2 %v1570_v16 }
  0x56   : > { %496 = vmatpush.msra.mxu1 %v495_v44  ;;  %829 = vmatpush.msrb.mxu0 %v409_v21  ;;  %v222_v44 = vld [vmem:[%s1540_s25 + $0x60] sm:$0xff]  ;;  %v362_v21 = vand.u32 4294901760, %v361_v7  ;;  %v368_v45 = vand.u32 4294901760, %v1790_v13 }
  0x57   : > { %1216 = vmatpush.msra.mxu3 %v501_v54  ;;  %579 = vmatpush.msrb.mxu2 %v1576_v19  ;;  %v1806_v14 = vand.u32 4294901760, %v222_v44 }
  0x58   : > { %355 = vmatmul.f32.gmra.mxu2 %v354_v30  ;;  %536 = vmatmul.f32.vlgmr.msra.gmra.mxu3 %v1644_v56  ;;  %v1814_v30 = vsub.f32 %v213_v57, %v1798_v50 }
  0x59   : > { %698 = vmatpush.msrb.mxu3 %v1550_v3  ;;  %502 = vmatpush.msra.mxu1 %v501_v54  ;;  %v297_v54 = vsub.f32 %v1782_v63, %v296_v2  ;;  %v1825_v15 = vsub.f32 %v222_v44, %v1806_v14  ;;  %v2217_v44 = vand.u32 4294901760, %v1592_v28 }
  0x5a   : > { %504 = vmatmul.f32.vlgmr.msra.gmra.mxu1 %v1693_v42  ;;  %833 = vmatpush.msrb.mxu0 %v415_v22  ;;  %v304_v16 = vand.u32 4294901760, %v1814_v30 }
  0x5b   : > { %700 = vmatpush.msrb.mxu3 %v1552_v4  ;;  %956 = vmatpush.msrb.mxu1 %v1550_v3  ;;  %v214_v3 = vld [vmem:[%s1540_s25 + $0x20] sm:$0xff]  ;;  %v298_v22 = vand.u32 4294901760, %v297_v54  ;;  %v376_v58 = vand.u32 4294901760, %v1825_v15 }
  0x5c   : > { %582 = vmatpush.msrb.mxu2 %v1579_v20  ;;  %291 = vmatmul.f32.gmra.mxu0 %v290_v37  ;;  %v305_v19 = vsub.f32 %v1814_v30, %v304_v16 }
  0x5d   : > { %702 = vmatpush.msrb.mxu3 %v1554_v5  ;;  %958 = vmatpush.msrb.mxu1 %v1552_v4  ;;  %v369_v4 = vsub.f32 %v1790_v13, %v368_v45  ;;  %v377_v37 = vsub.f32 %v1825_v15, %v376_v58 }
  0x5e   : > { %837 = vmatpush.msrb.mxu0 %v421_v23  ;;  %585 = vmatpush.msrb.mxu2 %v1592_v28  ;;  %v1832_v23 = vand.u32 4294901760, %v214_v3  ;;  %v2218_v28 = vand.u32 4294901760, %v1612_v36 }
  0x5f   : > { %704 = vmatpush.msrb.mxu3 %v1556_v9  ;;  %960 = vmatpush.msrb.mxu1 %v1554_v5  ;;  %v223_v5 = vld [vmem:[%s1540_s25 + $0x68] sm:$0xff]  ;;  %v370_v57 = vand.u32 4294901760, %v369_v4  ;;  %v378_v4 = vand.u32 4294901760, %v377_v37 }
  0x60   : > { %363 = vmatmul.f32.gmra.mxu2 %v362_v21  ;;  %540 = vmatmul.f32.gmra.mxu3 %v1697_v47  ;;  %v1850_v7 = vsub.f32 %v214_v3, %v1832_v23  ;;  %v306_v21 = vand.u32 4294901760, %v305_v19  ;;  %v2220_v19 = vand.u32 4294901760, %v1628_v46 }
  0x61   : > { %706 = vmatpush.msrb.mxu3 %v1558_v10  ;;  %841 = vmatpush.msrb.mxu0 %v427_v26  ;;  %v1847_v26 = vand.u32 4294901760, %v223_v5 }
  0x62   : > { %508 = vmatmul.f32.gmra.mxu1 %v1729_v25  ;;  %588 = vmatpush.msrb.mxu2 %v1612_v36  ;;  %v2219_v36 = vand.u32 4294901760, %v1618_v40 }
  0x63   : > { %708 = vmatpush.msrb.mxu3 %v1560_v11  ;;  %962 = vmatpush.msrb.mxu1 %v1556_v9  ;;  %v215_v9 = vld [vmem:[%s1540_s25 + $0x28] sm:$0xff]  ;;  %v1866_v20 = vsub.f32 %v223_v5, %v1847_v26 }
  0x64   : > { %299 = vmatmul.f32.gmra.mxu0 %v298_v22  ;;  %591 = vmatpush.msrb.mxu2 %v1618_v40  ;;  %v1870_v54 = vand.u32 4294901760, %v215_v9 }
  0x65   : > { %710 = vmatpush.msrb.mxu3 %v1573_v18  ;;  %845 = vmatpush.msrb.mxu0 %v433_v32  ;;  %v224_v32 = vld [vmem:[%s1540_s25 + $0x70] sm:$0xff]  ;;  %v384_v22 = vand.u32 4294901760, %v1866_v20 }
  0x66   : > { %964 = vmatpush.msrb.mxu1 %v1558_v10  ;;  %594 = vmatpush.msrb.mxu2 %v1628_v46  ;;  %v312_v10 = vand.u32 4294901760, %v1850_v7  ;;  %v1879_v3 = vand.u32 4294901760, %v224_v32  ;;  %v1887_v5 = vsub.f32 %v215_v9, %v1870_v54  ;;  %v225_v46 = vld [vmem:[%s1540_s25 + $0x78] sm:$0xff] }
  0x67   : > { %712 = vmatpush.msrb.mxu3 %v1585_v24  ;;  %849 = vmatpush.msrb.mxu0 %v2217_v44  ;;  %v385_v40 = vsub.f32 %v1866_v20, %v384_v22  ;;  %v2221_v44 = vand.u32 4294901760, %v1640_v53 }
  0x68   : > { %371 = vmatmul.f32.gmra.mxu2 %v370_v57  ;;  %544 = vmatmul.f32.gmra.mxu3 %v1742_v1  ;;  %v1896_v57 = vsub.f32 %v224_v32, %v1879_v3 }
  0x69   : > { %966 = vmatpush.msrb.mxu1 %v1560_v11  ;;  %714 = vmatpush.msrb.mxu3 %v1589_v27  ;;  %v313_v11 = vsub.f32 %v1850_v7, %v312_v10  ;;  %v386_v32 = vand.u32 4294901760, %v385_v40 }
  0x6a   : > { %512 = vmatmul.f32.gmra.mxu1 %v1770_v39  ;;  %853 = vmatpush.msrb.mxu0 %v2218_v28  ;;  %v1920_v28 = vand.u32 4294901760, %v225_v46 }
  0x6b   : > { %597 = vmatpush.msrb.mxu2 %v1640_v53  ;;  %968 = vmatpush.msrb.mxu1 %v1573_v18  ;;  %v216_v18 = vld [vmem:[%s1540_s25 + $0x30] sm:$0xff]  ;;  %v314_v9 = vand.u32 4294901760, %v313_v11  ;;  %v2222_v53 = vand.u32 4294901760, %v1653_v60  ;;  %v217_v11 = vld [vmem:[%s1540_s25 + $0x38] sm:$0xff] }
  0x6c   : > { %307 = vmatmul.f32.gmra.mxu0 %v306_v21  ;;  %716 = vmatpush.msrb.mxu3 %v1609_v35  ;;  %v1906_v37 = vand.u32 4294901760, %v216_v18  ;;  %v392_v21 = vand.u32 4294901760, %v1896_v57 }
  0x6d   : > { %857 = vmatpush.msrb.mxu0 %v2219_v36  ;;  %600 = vmatpush.msrb.mxu2 %v1653_v60  ;;  %v2223_v36 = vand.u32 4294901760, %v1664_v6 }
  0x6e   : > { %970 = vmatpush.msrb.mxu1 %v1585_v24  ;;  %718 = vmatpush.msrb.mxu3 %v1620_v41  ;;  %v320_v24 = vand.u32 4294901760, %v1887_v5 }
  0x6f   : > { %861 = vmatpush.msrb.mxu0 %v2220_v19  ;;  %603 = vmatpush.msrb.mxu2 %v1664_v6  ;;  %v1943_v19 = vand.u32 4294901760, %v217_v11  ;;  %v2224_v6 = vand.u32 4294901760, %v1679_v29 }
  0x70   : > { %379 = vmatmul.f32.gmra.mxu2 %v378_v4  ;;  %548 = vmatmul.f32.gmra.mxu3 %v1775_v34  ;;  %v1924_v4 = vsub.f32 %v216_v18, %v1906_v37  ;;  %v1940_v18 = vsub.f32 %v225_v46, %v1920_v28 }
  0x71   : > { %972 = vmatpush.msrb.mxu1 %v1589_v27  ;;  %720 = vmatpush.msrb.mxu3 %v1637_v52  ;;  %v321_v27 = vsub.f32 %v1887_v5, %v320_v24 }
  0x72   : > { %516 = vmatmul.f32.gmra.mxu1 %v1798_v50  ;;  %865 = vmatpush.msrb.mxu0 %v2221_v44  ;;  %v2225_v44 = vand.u32 4294901760, %v1691_v38 }
  0x73   : > { %606 = vmatpush.msrb.mxu2 %v1679_v29  ;;  %974 = vmatpush.msrb.mxu1 %v1609_v35  ;;  %v393_v35 = vsub.f32 %v1896_v57, %v392_v21  ;;  %v322_v60 = vand.u32 4294901760, %v321_v27  ;;  %v2226_v29 = vand.u32 4294901760, %v1705_v51 }
  0x74   : > { %315 = vmatmul.f32.gmra.mxu0 %v314_v9  ;;  %722 = vmatpush.msrb.mxu3 %v1650_v59  ;;  %v400_v9 = vand.u32 4294901760, %v1940_v18 }
  0x75   : > { %869 = vmatpush.msrb.mxu0 %v2222_v53  ;;  %609 = vmatpush.msrb.mxu2 %v1691_v38  ;;  %v394_v40 = vand.u32 4294901760, %v393_v35 }
  0x76   : > { %976 = vmatpush.msrb.mxu1 %v1620_v41  ;;  %724 = vmatpush.msrb.mxu3 %v1660_v0  ;;  %v328_v41 = vand.u32 4294901760, %v1924_v4 }
  0x77   : > { %873 = vmatpush.msrb.mxu0 %v2223_v36  ;;  %612 = vmatpush.msrb.mxu2 %v1705_v51 }
  0x78   : > { %387 = vmatmul.f32.gmra.mxu2 %v386_v32  ;;  %552 = vmatmul.f32.gmra.mxu3 %v1806_v14  ;;  %v329_v46 = vsub.f32 %v1924_v4, %v328_v41 }
  0x79   : > { %978 = vmatpush.msrb.mxu1 %v1637_v52  ;;  %615 = vmatpush.msrb.mxu2 %v1718_v62  ;;  %v335_v52 = vsub.f32 %v217_v11, %v1943_v19 }
  0x7a   : > { %520 = vmatmul.f32.gmra.mxu1 %v1832_v23  ;;  %726 = vmatpush.msrb.mxu3 %v1675_v17  ;;  %v330_v32 = vand.u32 4294901760, %v329_v46 }
  0x7b   : > { %877 = vmatpush.msrb.mxu0 %v2224_v6  ;;  %980 = vmatpush.msrb.mxu1 %v1650_v59  ;;  %v401_v59 = vsub.f32 %v1940_v18, %v400_v9  ;;  %v336_v27 = vand.u32 4294901760, %v335_v52 }
  0x7c   : > { %323 = vmatmul.f32.gmra.mxu0 %v322_v60  ;;  %728 = vmatpush.msrb.mxu3 %v1682_v33 }
  0x7d   : > { %881 = vmatpush.msrb.mxu0 %v2225_v44  ;;  %982 = vmatpush.msrb.mxu1 %v1660_v0  ;;  %v402_v0 = vand.u32 4294901760, %v401_v59  ;;  %v337_v38 = vsub.f32 %v335_v52, %v336_v27 }
  0x7f   : > { %885 = vmatpush.msrb.mxu0 %v2226_v29  ;;  %984 = vmatpush.msrb.mxu1 %v1675_v17  ;;  %v338_v17 = vand.u32 4294901760, %v337_v38 }
  0x80   : > { %395 = vmatmul.f32.gmra.mxu2 %v394_v40  ;;  %556 = vmatmul.f32.gmra.mxu3 %v1847_v26 }
  0x81   : > { %889 = vmatpush.msrb.mxu0 %v499_v49  ;;  %986 = vmatpush.msrb.mxu1 %v1682_v33  ;;  %v2227_v33 = vand.u32 4294901760, %v1708_v55 }
  0x82   : > { %524 = vmatmul.f32.gmra.mxu1 %v1870_v54 }
  0x84   : > { %331 = vmatmul.f32.gmra.mxu0 %v330_v32 }
  0x88   : > { %403 = vmatmul.f32.gmra.mxu2 %v402_v0  ;;  %560 = vmatmul.f32.gmra.mxu3 %v1879_v3 }
  0x8a   : > { %528 = vmatmul.f32.gmra.mxu1 %v1906_v37 }
  0x8c   : > { %339 = vmatmul.f32.gmra.mxu0 %v338_v17 }
  0x90   : > { %564 = vmatmul.f32.gmra.mxu3 %v1920_v28  ;;  %618 = vmatmul.f32.vlgmr.msrb.gmra.mxu2 %v1708_v55  ;;  %v2228_v55 = vand.u32 4294901760, %v1671_v8 }
  0x92   : > { %532 = vmatmul.f32.gmra.mxu1 %v1943_v19 }
  0x94   : > { %891 = vmatmul.f32.vlgmr.msrb.gmra.mxu0 %v1693_v42 }
  0x98   : > { %623 = vmatmul.f32.gmra.mxu2 %v1750_v61  ;;  %732 = vmatmul.f32.vlgmr.msrb.gmra.mxu3 %v2227_v33 }
  0x9a   : > { %988 = vmatmul.f32.vlgmr.msrb.gmra.mxu1 %v1693_v42 }
  0x9c   : > { %895 = vmatmul.f32.gmra.mxu0 %v1729_v25 }
  0xa0   : > { %628 = vmatmul.f32.gmra.mxu2 %v1782_v63  ;;  %738 = vmatmul.f32.gmra.mxu3 %v288_v31 }
  0xa2   : > { %992 = vmatmul.f32.gmra.mxu1 %v1729_v25 }
  0xa4   : > { %899 = vmatmul.f32.gmra.mxu0 %v1770_v39 }
  0xa8   : > { %633 = vmatmul.f32.gmra.mxu2 %v1814_v30  ;;  %744 = vmatmul.f32.gmra.mxu3 %v296_v2  ;;  %v2229_v30 = vand.u32 4294901760, %v1725_v12 }
  0xaa   : > { %996 = vmatmul.f32.gmra.mxu1 %v1770_v39  ;;  %v2012_v39 = vld [vmem:[%s2197_s2] ss:$0 sm:$0xff] }
  0xac   : > { %903 = vmatmul.f32.gmra.mxu0 %v1798_v50 }
  0xb0   : > { %638 = vmatmul.f32.gmra.mxu2 %v1850_v7  ;;  %750 = vmatmul.f32.gmra.mxu3 %v304_v16 }
  0xb2   : > { %1000 = vmatmul.f32.gmra.mxu1 %v1798_v50 }
  0xb4   : > { %907 = vmatmul.f32.gmra.mxu0 %v1832_v23 }
  0xb8   : > { %643 = vmatmul.f32.gmra.mxu2 %v1887_v5  ;;  %756 = vmatmul.f32.gmra.mxu3 %v312_v10 }
  0xba   : > { %1004 = vmatmul.f32.gmra.mxu1 %v1832_v23 }
  0xbc   : > { %911 = vmatmul.f32.gmra.mxu0 %v1870_v54 }
  0xc0   : > { %648 = vmatmul.f32.gmra.mxu2 %v1924_v4  ;;  %762 = vmatmul.f32.gmra.mxu3 %v320_v24 }
  0xc2   : > { %1008 = vmatmul.f32.gmra.mxu1 %v1870_v54 }
  0xc4   : > { %915 = vmatmul.f32.gmra.mxu0 %v1906_v37 }
  0xc8   : > { %653 = vmatmul.f32.gmra.mxu2 %v335_v52  ;;  %768 = vmatmul.f32.gmra.mxu3 %v328_v41 }
  0xca   : > { %1012 = vmatmul.f32.gmra.mxu1 %v1906_v37 }
  0xcc   : > { %919 = vmatmul.f32.gmra.mxu0 %v1943_v19 }
  0xd0   : > { %658 = vmatmul.f32.gmra.mxu2 %v1671_v8  ;;  %774 = vmatmul.f32.gmra.mxu3 %v336_v27 }
  0xd1   : > { %v2014_v25 = vpop.f32.mrf.mxu0 }
  0xd2   : > { %1016 = vmatmul.f32.gmra.mxu1 %v1943_v19 }
  0xd3   : > { %v348_v42 = vpop.f32.mrf.mxu2 }
  0xd4   : > { %v349_v50 = vadd.f32 %v2012_v39, %v348_v42  ;;  %923 = vmatmul.f32.gmra.mxu0 %v1644_v56 }
  0xd7   : > { %v2019_v51 = vpop.f32.mrf.mxu1 }
  0xd8   : > { %663 = vmatmul.f32.gmra.mxu2 %v1725_v12  ;;  %780 = vmatmul.f32.gmra.mxu3 %v2228_v55 }
  0xd9   : > { %v2024_v62 = vpop.f32.mrf.mxu0 }
  0xda   : > { %1020 = vmatmul.f32.gmra.mxu1 %v1644_v56 }
  0xdb   : > { %v356_v31 = vpop.f32.mrf.mxu2  ;;  %v537_v49 = vpop.f32.mrf.mxu3 }
  0xdc   : > { %v357_v61 = vadd.f32 %v2012_v39, %v356_v31  ;;  %v2028_v63 = vadd.f32 %v537_v49, %v349_v50  ;;  %927 = vmatmul.f32.gmra.mxu0 %v1697_v47 }
  0xdf   : > { %v2031_v2 = vpop.f32.mrf.mxu1 }
  0xe0   : > { %668 = vmatmul.f32.gmra.mxu2 %v1763_v48  ;;  %786 = vmatmul.f32.gmra.mxu3 %v2229_v30 }
  0xe1   : > { %v2036_v8 = vpop.f32.mrf.mxu0 }
  0xe2   : > { %1024 = vmatmul.f32.gmra.mxu1 %v1697_v47  ;;  %v301_v49 = vadd.f32 %v2012_v39, %v2036_v8 }
  0xe3   : > { %v364_v56 = vpop.f32.mrf.mxu2  ;;  %v541_v16 = vpop.f32.mrf.mxu3 }
  0xe4   : > { %v365_v23 = vadd.f32 %v2012_v39, %v364_v56  ;;  %v2040_v7 = vadd.f32 %v541_v16, %v357_v61  ;;  %931 = vmatmul.f32.gmra.mxu0 %v1742_v1 }
  0xe7   : > { %v2043_v10 = vpop.f32.mrf.mxu1 }
  0xe8   : > { %673 = vmatmul.f32.gmra.mxu2 %v1790_v13  ;;  %792 = vmatmul.f32.gmra.mxu3 %v360_v43 }
  0xe9   : > { %v2048_v12 = vpop.f32.mrf.mxu0 }
  0xea   : > { %1028 = vmatmul.f32.gmra.mxu1 %v1742_v1 }
  0xeb   : > { %v372_v47 = vpop.f32.mrf.mxu2  ;;  %v545_v54 = vpop.f32.mrf.mxu3 }
  0xec   : > { %v373_v5 = vadd.f32 %v2012_v39, %v372_v47  ;;  %v2052_v24 = vadd.f32 %v545_v54, %v365_v23  ;;  %935 = vmatmul.f32.gmra.mxu0 %v1775_v34 }
  0xef   : > { %v2055_v37 = vpop.f32.mrf.mxu1 }
  0xf0   : > { %678 = vmatmul.f32.gmra.mxu2 %v1825_v15  ;;  %798 = vmatmul.f32.gmra.mxu3 %v368_v45 }
  0xf1   : > { %v2060_v48 = vpop.f32.mrf.mxu0 }
  0xf2   : > { %1032 = vmatmul.f32.gmra.mxu1 %v1775_v34 }
  0xf3   : > { %v380_v1 = vpop.f32.mrf.mxu2  ;;  %v549_v43 = vpop.f32.mrf.mxu3 }
  0xf4   : > { %v381_v4 = vadd.f32 %v2012_v39, %v380_v1  ;;  %v2064_v53 = vadd.f32 %v549_v43, %v373_v5  ;;  %939 = vmatmul.f32.gmra.mxu0 %v1806_v14  ;;  %v309_v5 = vadd.f32 %v2012_v39, %v2048_v12 }
  0xf6   : > { %v518_v8 = vadd.f32 %v2055_v37, %v309_v5 }
  0xf7   : > { %v2067_v11 = vpop.f32.mrf.mxu1 }
  0xf8   : > { %683 = vmatmul.f32.gmra.mxu2 %v1866_v20  ;;  %804 = vmatmul.f32.gmra.mxu3 %v376_v58 }
  0xf9   : > { %v2072_v13 = vpop.f32.mrf.mxu0 }
  0xfa   : > { %1036 = vmatmul.f32.gmra.mxu1 %v1806_v14 }
  0xfb   : > { %v388_v34 = vpop.f32.mrf.mxu2  ;;  %v553_v45 = vpop.f32.mrf.mxu3 }
  0xfc   : > { %v389_v35 = vadd.f32 %v2012_v39, %v388_v34  ;;  %v2076_v36 = vadd.f32 %v553_v45, %v381_v4  ;;  %943 = vmatmul.f32.gmra.mxu0 %v1847_v26 }
  0xff   : > { %v2079_v60 = vpop.f32.mrf.mxu1 }
 0x100   : > { %688 = vmatmul.f32.gmra.mxu2 %v1896_v57  ;;  %810 = vmatmul.f32.gmra.mxu3 %v384_v22 }
 0x101   : > { %v2084_v15 = vpop.f32.mrf.mxu0 }
 0x102   : > { %1040 = vmatmul.f32.gmra.mxu1 %v1847_v26 }
 0x103   : > { %v396_v14 = vpop.f32.mrf.mxu2  ;;  %v557_v58 = vpop.f32.mrf.mxu3 }
 0x104   : > { %v397_v41 = vadd.f32 %v2012_v39, %v396_v14  ;;  %v2088_v19 = vadd.f32 %v557_v58, %v389_v35  ;;  %947 = vmatmul.f32.gmra.mxu0 %v1879_v3  ;;  %v317_v58 = vadd.f32 %v2012_v39, %v2060_v48 }
 0x106   : > { %v522_v12 = vadd.f32 %v2067_v11, %v317_v58 }
 0x107   : > { %v2091_v6 = vpop.f32.mrf.mxu1 }
 0x108   : > { %693 = vmatmul.f32.gmra.mxu2 %v1940_v18  ;;  %816 = vmatmul.f32.gmra.mxu3 %v392_v21  ;;  %v293_v18 = vadd.f32 %v2012_v39, %v2024_v62 }
 0x109   : > { %v2096_v20 = vpop.f32.mrf.mxu0 }
 0x10a   : > { %1044 = vmatmul.f32.gmra.mxu1 %v1879_v3  ;;  %v285_v3 = vadd.f32 %v2012_v39, %v2014_v25  ;;  %v510_v42 = vadd.f32 %v2031_v2, %v293_v18  ;;  %v514_v2 = vadd.f32 %v2043_v10, %v301_v49 }
 0x10b   : > { %v404_v26 = vpop.f32.mrf.mxu2  ;;  %v561_v22 = vpop.f32.mrf.mxu3 }
 0x10c   : > { %v405_v40 = vadd.f32 %v2012_v39, %v404_v26  ;;  %v2100_v46 = vadd.f32 %v561_v22, %v397_v41  ;;  %951 = vmatmul.f32.gmra.mxu0 %v1920_v28  ;;  %v506_v32 = vadd.f32 %v2019_v51, %v285_v3  ;;  %v325_v3 = vadd.f32 %v2012_v39, %v2072_v13 }
 0x10e   : > { %v526_v48 = vadd.f32 %v2079_v60, %v325_v3 }
 0x10f   : > { %v2103_v52 = vpop.f32.mrf.mxu1 }
 0x110   : > { %822 = vmatmul.f32.gmra.mxu3 %v400_v9 }
 0x111   : > { %v892_v44 = vpop.f32.mrf.mxu0 }
 0x112   : > { %1048 = vmatmul.f32.gmra.mxu1 %v1920_v28 }
 0x113   : > { %v565_v57 = vpop.f32.mrf.mxu3  ;;  %v619_v21 = vpop.f32.mrf.mxu2 }
 0x114   : > { %v2110_v29 = vadd.f32 %v565_v57, %v405_v40  ;;  %v620_v0 = vadd.f32 %v619_v21, %v506_v32 }
 0x117   : > { %v989_v59 = vpop.f32.mrf.mxu1 }
 0x119   : > { %v896_v27 = vpop.f32.mrf.mxu0 }
 0x11b   : > { %v624_v38 = vpop.f32.mrf.mxu2  ;;  %v733_v17 = vpop.f32.mrf.mxu3 }
 0x11c   : > { %v734_v9 = vadd.f32 %v733_v17, %v620_v0  ;;  %v625_v55 = vadd.f32 %v624_v38, %v510_v42 }
 0x11e   : > { %v893_v28 = vadd.f32 %v892_v44, %v734_v9  ;;  %v333_v9 = vadd.f32 %v2012_v39, %v2084_v15 }
 0x11f   : > { %v993_v33 = vpop.f32.mrf.mxu1 }
 0x120   : > { %v990_v50 = vadd.f32 %v989_v59, %v893_v28  ;;  %v530_v13 = vadd.f32 %v2091_v6, %v333_v9 }
 0x121   : > { %v900_v25 = vpop.f32.mrf.mxu0 }
 0x122   : > { %1052 = vst [vmem:[%s2118_s27] sm:$0xff] %v990_v50 }
 0x123   : > { %v629_v51 = vpop.f32.mrf.mxu2  ;;  %v739_v31 = vpop.f32.mrf.mxu3 }
 0x124   : > { %v740_v62 = vadd.f32 %v739_v31, %v625_v55  ;;  %v630_v23 = vadd.f32 %v629_v51, %v514_v2  ;;  %v341_v31 = vadd.f32 %v2012_v39, %v2096_v20 }
 0x126   : > { %v897_v61 = vadd.f32 %v896_v27, %v740_v62  ;;  %v534_v15 = vadd.f32 %v2103_v52, %v341_v31 }
 0x127   : > { %v997_v30 = vpop.f32.mrf.mxu1 }
 0x128   : > { %v994_v56 = vadd.f32 %v993_v33, %v897_v61 }
 0x129   : > { %v904_v16 = vpop.f32.mrf.mxu0 }
 0x12a   : > { %1053 = vst [vmem:[%s2118_s27 + $0x8] sm:$0xff] %v994_v56 }
 0x12b   : > { %v634_v47 = vpop.f32.mrf.mxu2  ;;  %v745_v54 = vpop.f32.mrf.mxu3 }
 0x12c   : > { %v746_v1 = vadd.f32 %v745_v54, %v630_v23  ;;  %v635_v35 = vadd.f32 %v634_v47, %v518_v8 }
 0x12e   : > { %v901_v43 = vadd.f32 %v900_v25, %v746_v1 }
 0x12f   : > { %v1001_v4 = vpop.f32.mrf.mxu1 }
 0x130   : > { %v998_v34 = vadd.f32 %v997_v30, %v901_v43 }
 0x131   : > { %v908_v45 = vpop.f32.mrf.mxu0 }
 0x132   : > { %1054 = vst [vmem:[%s2118_s27 + $0x10] sm:$0xff] %v998_v34 }
 0x133   : > { %v639_v10 = vpop.f32.mrf.mxu2  ;;  %v751_v14 = vpop.f32.mrf.mxu3 }
 0x134   : > { %v752_v41 = vadd.f32 %v751_v14, %v635_v35  ;;  %v640_v57 = vadd.f32 %v639_v10, %v522_v12 }
 0x136   : > { %v905_v26 = vadd.f32 %v904_v16, %v752_v41 }
 0x137   : > { %v1005_v22 = vpop.f32.mrf.mxu1 }
 0x138   : > { %v1002_v40 = vadd.f32 %v1001_v4, %v905_v26 }
 0x139   : > { %v912_v44 = vpop.f32.mrf.mxu0 }
 0x13a   : > { %1055 = vst [vmem:[%s2118_s27 + $0x18] sm:$0xff] %v1002_v40 }
 0x13b   : > { %v644_v37 = vpop.f32.mrf.mxu2  ;;  %v757_v21 = vpop.f32.mrf.mxu3 }
 0x13c   : > { %v758_v59 = vadd.f32 %v757_v21, %v640_v57  ;;  %v645_v17 = vadd.f32 %v644_v37, %v526_v48 }
 0x13e   : > { %v909_v32 = vadd.f32 %v908_v45, %v758_v59 }
 0x13f   : > { %v1009_v27 = vpop.f32.mrf.mxu1 }
 0x140   : > { %v1006_v0 = vadd.f32 %v1005_v22, %v909_v32 }
 0x141   : > { %v916_v38 = vpop.f32.mrf.mxu0 }
 0x142   : > { %1056 = vst [vmem:[%s2118_s27 + $0x20] sm:$0xff] %v1006_v0 }
 0x143   : > { %v649_v11 = vpop.f32.mrf.mxu2  ;;  %v763_v18 = vpop.f32.mrf.mxu3 }
 0x144   : > { %v764_v28 = vadd.f32 %v763_v18, %v645_v17  ;;  %v650_v55 = vadd.f32 %v649_v11, %v530_v13 }
 0x146   : > { %v913_v33 = vadd.f32 %v912_v44, %v764_v28 }
 0x147   : > { %v1013_v42 = vpop.f32.mrf.mxu1 }
 0x148   : > { %v1010_v50 = vadd.f32 %v1009_v27, %v913_v33 }
 0x149   : > { %v920_v25 = vpop.f32.mrf.mxu0 }
 0x14a   : > { %1057 = vst [vmem:[%s2118_s27 + $0x28] sm:$0xff] %v1010_v50 }
 0x14b   : > { %v654_v60 = vpop.f32.mrf.mxu2  ;;  %v769_v51 = vpop.f32.mrf.mxu3 }
 0x14c   : > { %v770_v49 = vadd.f32 %v769_v51, %v650_v55  ;;  %v655_v56 = vadd.f32 %v654_v60, %v534_v15 }
 0x14e   : > { %v917_v62 = vadd.f32 %v916_v38, %v770_v49 }
 0x14f   : > { %v1017_v61 = vpop.f32.mrf.mxu1 }
 0x150   : > { %v1014_v30 = vadd.f32 %v1013_v42, %v917_v62 }
 0x151   : > { %v924_v2 = vpop.f32.mrf.mxu0 }
 0x152   : > { %1058 = vst [vmem:[%s2118_s27 + $0x30] sm:$0xff] %v1014_v30 }
 0x153   : > { %v659_v6 = vpop.f32.mrf.mxu2  ;;  %v775_v16 = vpop.f32.mrf.mxu3 }
 0x154   : > { %v776_v23 = vadd.f32 %v775_v16, %v655_v56  ;;  %v660_v39 = vadd.f32 %v659_v6, %v2028_v63 }
 0x156   : > { %v921_v47 = vadd.f32 %v920_v25, %v776_v23 }
 0x157   : > { %v1021_v54 = vpop.f32.mrf.mxu1 }
 0x158   : > { %v1018_v5 = vadd.f32 %v1017_v61, %v921_v47 }
 0x159   : > { %v928_v1 = vpop.f32.mrf.mxu0 }
 0x15a   : > { %1059 = vst [vmem:[%s2118_s27 + $0x38] sm:$0xff] %v1018_v5 }
 0x15b   : > { %v664_v20 = vpop.f32.mrf.mxu2  ;;  %v781_v43 = vpop.f32.mrf.mxu3 }
 0x15c   : > { %v782_v4 = vadd.f32 %v781_v43, %v660_v39  ;;  %v665_v35 = vadd.f32 %v664_v20, %v2040_v7 }
 0x15e   : > { %v925_v52 = vadd.f32 %v924_v2, %v782_v4 }
 0x15f   : > { %v1025_v8 = vpop.f32.mrf.mxu1 }
 0x160   : > { %v1022_v34 = vadd.f32 %v1021_v54, %v925_v52 }
 0x161   : > { %v932_v45 = vpop.f32.mrf.mxu0 }
 0x162   : > { %1060 = vst [vmem:[%s2118_s27 + $0x40] sm:$0xff] %v1022_v34 }
 0x163   : > { %v669_v10 = vpop.f32.mrf.mxu2  ;;  %v787_v14 = vpop.f32.mrf.mxu3 }
 0x164   : > { %v788_v58 = vadd.f32 %v787_v14, %v665_v35  ;;  %v670_v63 = vadd.f32 %v669_v10, %v2052_v24 }
 0x166   : > { %v929_v41 = vadd.f32 %v928_v1, %v788_v58 }
 0x167   : > { %v1029_v26 = vpop.f32.mrf.mxu1 }
 0x168   : > { %v1026_v22 = vadd.f32 %v1025_v8, %v929_v41 }
 0x169   : > { %v936_v12 = vpop.f32.mrf.mxu0 }
 0x16a   : > { %1061 = vst [vmem:[%s2118_s27 + $0x48] sm:$0xff] %v1026_v22 }
 0x16b   : > { %v674_v40 = vpop.f32.mrf.mxu2  ;;  %v793_v44 = vpop.f32.mrf.mxu3 }
 0x16c   : > { %v794_v57 = vadd.f32 %v793_v44, %v670_v63  ;;  %v675_v7 = vadd.f32 %v674_v40, %v2064_v53 }
 0x16e   : > { %v933_v37 = vadd.f32 %v932_v45, %v794_v57 }
 0x16f   : > { %v1033_v21 = vpop.f32.mrf.mxu1 }
 0x170   : > { %v1030_v3 = vadd.f32 %v1029_v26, %v933_v37 }
 0x171   : > { %v940_v48 = vpop.f32.mrf.mxu0 }
 0x172   : > { %1062 = vst [vmem:[%s2118_s27 + $0x50] sm:$0xff] %v1030_v3 }
 0x173   : > { %v679_v59 = vpop.f32.mrf.mxu2  ;;  %v799_v32 = vpop.f32.mrf.mxu3 }
 0x174   : > { %v800_v27 = vadd.f32 %v799_v32, %v675_v7  ;;  %v680_v17 = vadd.f32 %v679_v59, %v2076_v36 }
 0x176   : > { %v937_v0 = vadd.f32 %v936_v12, %v800_v27 }
 0x177   : > { %v1037_v38 = vpop.f32.mrf.mxu1 }
 0x178   : > { %v1034_v24 = vadd.f32 %v1033_v21, %v937_v0 }
 0x179   : > { %v944_v33 = vpop.f32.mrf.mxu0 }
 0x17a   : > { %1063 = vst [vmem:[%s2118_s27 + $0x58] sm:$0xff] %v1034_v24 }
 0x17b   : > { %v684_v11 = vpop.f32.mrf.mxu2  ;;  %v805_v18 = vpop.f32.mrf.mxu3 }
 0x17c   : > { %v806_v9 = vadd.f32 %v805_v18, %v680_v17  ;;  %v685_v13 = vadd.f32 %v684_v11, %v2088_v19 }
 0x17e   : > { %v941_v28 = vadd.f32 %v940_v48, %v806_v9 }
 0x17f   : > { %v1041_v53 = vpop.f32.mrf.mxu1 }
 0x180   : > { %v1038_v42 = vadd.f32 %v1037_v38, %v941_v28 }
 0x181   : > { %v948_v36 = vpop.f32.mrf.mxu0 }
 0x182   : > { %1064 = vst [vmem:[%s2118_s27 + $0x60] sm:$0xff] %v1038_v42 }
 0x183   : > { %v811_v50 = vpop.f32.mrf.mxu3  ;;  %v689_v55 = vpop.f32.mrf.mxu2 }
 0x184   : > { %v812_v25 = vadd.f32 %v811_v50, %v685_v13  ;;  %v690_v31 = vadd.f32 %v689_v55, %v2100_v46 }
 0x186   : > { %v945_v60 = vadd.f32 %v944_v33, %v812_v25 }
 0x187   : > { %v1045_v62 = vpop.f32.mrf.mxu1 }
 0x188   : > { %v1042_v51 = vadd.f32 %v1041_v53, %v945_v60 }
 0x189   : > { %v952_v46 = vpop.f32.mrf.mxu0 }
 0x18a   : > { %1065 = vst [vmem:[%s2118_s27 + $0x68] sm:$0xff] %v1042_v51 }
 0x18b   : > { %v817_v49 = vpop.f32.mrf.mxu3  ;;  %v694_v30 = vpop.f32.mrf.mxu2 }
 0x18c   : > { %v818_v61 = vadd.f32 %v817_v49, %v690_v31  ;;  %v695_v2 = vadd.f32 %v694_v30, %v2110_v29 }
 0x18e   : > { %v949_v15 = vadd.f32 %v948_v36, %v818_v61 }
 0x18f   : > { %v1049_v16 = vpop.f32.mrf.mxu1 }
 0x190   : > { %v1046_v19 = vadd.f32 %v1045_v62, %v949_v15 }
 0x192   : > { %1066 = vst [vmem:[%s2118_s27 + $0x70] sm:$0xff] %v1046_v19 }
 0x193   : > { %v823_v56 = vpop.f32.mrf.mxu3 }
 0x194   : > { %v824_v6 = vadd.f32 %v823_v56, %v695_v2 }
 0x196   : > { %v953_v23 = vadd.f32 %v952_v46, %v824_v6 }
 0x198   : > { %v1050_v47 = vadd.f32 %v1049_v16, %v953_v23 }
 0x19a   : > { %1067 = vst [vmem:[%s2118_s27 + $0x78] sm:$0xff] %v1050_v47 }
 0x19b   : > { %1366 = shalt.err (!%p1363_p10)
}
 0x19c   : > { %s1414_s6 = smov 128   ;;  %s1415_s25 = smov 8  }
 0x19d   : > { %1223 = dma.vmem_to_hbm [thread:$0]  (%p1504_p0), %s1082_s24, 2048, %s1084_s29, %s1069_s16, %s1414_s6, %s1414_s6, %s1415_s25  }
 0x19e PF: > { %p1240_p11 = scmp.ge.s32.totalorder %s1409_s15, 2  ;;  %s1098_s18 = sand.u32 1, %s1397_s12  }
 0x19f   : > { %s1099_s23 = scalar_lea.sflag [#allocation4], %s1098_s18 }
 0x1a0   : > { %p1234_p12 = pnand %p1240_p11, %p1471_p6 }
 0x1a2   : > { %p1235_p13 = pneg %p1234_p12 }
 0x1a4   : > { %1392 = dma.done.wait (%p1235_p13), %s1099_s23, 2048  }
 0x1a5   : > { %1394 = vsyncadd (%p1235_p13), %s1099_s23, 4294965248  ;;  %p17_p3 = scmp.ge.s32.totalorder %s1488_s26, 6   ;;  %s2230_s12 = smov %s1401_s13 }
 0x1a6   : > { %s2231_s13 = smov %s1405_s14  ;;  %s2232_s14 = smov %s1500_s4 }
 0x1a7   : > { %s2233_s15 = smov %s1488_s26  ;;  %19 = sbr.rel (!%p17_p3) target bundleno = 6 (0x6), region = 81 }
 0x1ac   :  { %1105 = vsyncpa [#allocation3], 1 }
 0x1ad   :  { %1107 = vsyncpa [#allocation3 + $0x1], 1 }
 0x1ae   :  { %1108 = vsyncpa [#allocation6], 1 }
 0x1af   :  { %1109 = vsyncpa [#allocation4], 1 }
 0x1b0   :  { %1111 = vsyncpa [#allocation4 + $0x1], 1 }

</bundles_post_ra>
